<compile_context>
chip_gen: v7x
topology: tpu7x:2x2x1
jax: 0.10.0
libtpu: 0.0.40
codegen_flags: <defaults>
</compile_context>

<pallas_src>
import functools

import jax
import jax.numpy as jnp
from jax.experimental import pallas as pl
from jax.experimental.pallas import tpu as pltpu


# ----------------------------------------------------------------------------
# Fused MHA kernel: one grid step == `batch_tile` batch elements, all in VMEM.
# ----------------------------------------------------------------------------
def _fused_mha_kernel(x_ref, wqkv_ref, bqkv_ref, wo_ref, bo_ref, o_ref,
                      attn_ref, *, n_heads):
    """
    x_ref    : (Bt, L, E)  f32 activations for this batch block
    wqkv_ref : (3E, E)     bf16 folded [Wq_eff*scale; Wk_eff; Wv_eff]
    bqkv_ref : (1, 3E)     f32 folded biases (q rows pre-scaled)
    wo_ref   : (E, E)      bf16 out_proj weight (PyTorch layout: (out, in))
    bo_ref   : (1, E)      f32 out_proj bias
    o_ref    : (Bt, L, E)
    attn_ref : (L, E)      f32 VMEM scratch slab (merged-head attention out)
    """
    Bt, L, E = x_ref.shape
    hd = E // n_heads

    # Contract dim 1 of x with dim 1 of W  ==  x @ W^T (native MXU trans_b).
    trans_b = (((1,), (1,)), ((), ()))

    w_qkv = wqkv_ref[...]          # bf16, resident
    w_out = wo_ref[...]            # bf16, resident
    b_qkv = bqkv_ref[...]          # f32
    b_out = bo_ref[...]            # f32

    for b in range(Bt):            # static unroll (Bt is small)
        x = x_ref[b].astype(jnp.bfloat16)                      # (L, E)

        # Fused Q/K/V projection: one bf16 MXU matmul, f32 accumulate.
        qkv = jax.lax.dot_general(x, w_qkv, dimension_numbers=trans_b,
                                  preferred_element_type=jnp.float32)
        qkv = qkv + b_qkv                                       # (L, 3E), f32

        # Per-head scaled dot-product attention. 1/sqrt(hd) already folded
        # into the q rows of W_qkv/b_qkv. NOTE: at hd=8 each QK^T / P·V uses
        # <7% of an MXU pass on any generation (see TODO above).
        for h in range(n_heads):
            q = qkv[:, h * hd:(h + 1) * hd].astype(jnp.bfloat16)
            k = qkv[:, E + h * hd:E + (h + 1) * hd].astype(jnp.bfloat16)
            v = qkv[:, 2 * E + h * hd:2 * E + (h + 1) * hd].astype(jnp.bfloat16)

            s = jax.lax.dot_general(q, k, dimension_numbers=trans_b,
                                    preferred_element_type=jnp.float32)
            # f32 softmax; reciprocal runs on the otherwise-idle EUP.
            s = s - jnp.max(s, axis=-1, keepdims=True)
            p = jnp.exp(s)
            p = p * pl.reciprocal(jnp.sum(p, axis=-1, keepdims=True),
                                  approx=True)

            # Write this head's output directly into the merged-head slab.
            attn_ref[:, h * hd:(h + 1) * hd] = jnp.dot(
                p.astype(jnp.bfloat16), v, preferred_element_type=jnp.float32)

        # out_proj (bf16 MXU matmul, f32 accumulate + bias).
        attn = attn_ref[...].astype(jnp.bfloat16)               # (L, E)
        out = jax.lax.dot_general(attn, w_out, dimension_numbers=trans_b,
                                  preferred_element_type=jnp.float32)
        out = out + b_out
        o_ref[b] = out.astype(o_ref.dtype)


# ----------------------------------------------------------------------------
# One-time parameter folding (call once at init, NOT per forward)
# ----------------------------------------------------------------------------
def prepare_params(params, n_heads, compute_dtype=jnp.bfloat16):
    """Folds proj_{q,k,v} into the packed in_proj, concatenates Q/K/V into one
    (3E, E) matrix, folds the 1/sqrt(head_dim) scale into the Q rows, and
    casts matmul weights to bf16 (biases stay f32)."""
    E = params["out_proj_w"].shape[0]
    hd = E // n_heads
    scale = 1.0 / float(hd) ** 0.5

    Wq_in = params["in_proj_w"][0:E]
    Wk_in = params["in_proj_w"][E:2 * E]
    Wv_in = params["in_proj_w"][2 * E:3 * E]
    bq_in = params["in_proj_b"][0:E]
    bk_in = params["in_proj_b"][E:2 * E]
    bv_in = params["in_proj_b"][2 * E:3 * E]

    # (x @ Wp^T + bp) @ Win^T + bin == x @ (Win @ Wp)^T + (Win @ bp + bin)
    Wq_eff = (Wq_in @ params["proj_q_w"]) * scale
    Wk_eff = Wk_in @ params["proj_k_w"]
    Wv_eff = Wv_in @ params["proj_v_w"]
    bq_eff = (Wq_in @ params["proj_q_b"] + bq_in) * scale
    bk_eff = Wk_in @ params["proj_k_b"] + bk_in
    bv_eff = Wv_in @ params["proj_v_b"] + bv_in

    return {
        "W_qkv": jnp.concatenate([Wq_eff, Wk_eff, Wv_eff],
                                 axis=0).astype(compute_dtype),        # (3E, E)
        "b_qkv": jnp.concatenate([bq_eff, bk_eff, bv_eff]
                                 ).reshape(1, 3 * E).astype(jnp.float32),
        "W_out": params["out_proj_w"].astype(compute_dtype),           # (E, E)
        "b_out": params["out_proj_b"].reshape(1, E).astype(jnp.float32),
    }


# ----------------------------------------------------------------------------
# pallas_call construction
# ----------------------------------------------------------------------------
def _vmem_limit_bytes(batch_tile, L, E):
    f32, bf16 = 4, 2
    weights = (3 * E * E + E * E) * bf16 + 4 * E * f32        # single-buffered
    io = 2 * 2 * batch_tile * L * E * f32                     # x + out, x2 bufs
    scratch = L * E * f32
    live = (3 * E * L + 3 * L * L + 2 * L * E) * f32          # qkv/scores/attn
    est = 4 * (weights + io + scratch + live)                 # relayout headroom
    # floor 32 MiB (>= every gen's scoped default), cap 64 MiB (v7x physical)
    return int(min(max(est, 32 << 20), 64 << 20))


def _mha_pallas_call(B, L, E, n_heads, batch_tile, out_dtype,
                     single_buffer_weights):
    def const_spec(shape):
        # Resident constants: block index never changes across the grid.
        idx = lambda *_: (0,) * len(shape)
        if single_buffer_weights:
            return pl.BlockSpec(shape, idx, pipeline_mode=pl.Buffered(1))
        return pl.BlockSpec(shape, idx)

    kernel = functools.partial(_fused_mha_kernel, n_heads=n_heads)
    return pl.pallas_call(
        kernel,
        out_shape=jax.ShapeDtypeStruct((B, L, E), out_dtype),
        grid=(B // batch_tile,),
        in_specs=[
            pl.BlockSpec((batch_tile, L, E), lambda b: (b, 0, 0)),   # x
            const_spec((3 * E, E)),                                  # W_qkv
            const_spec((1, 3 * E)),                                  # b_qkv
            const_spec((E, E)),                                      # W_out
            const_spec((1, E)),                                      # b_out
        ],
        out_specs=pl.BlockSpec((batch_tile, L, E), lambda b: (b, 0, 0)),
        scratch_shapes=[pltpu.VMEM((L, E), jnp.float32)],            # head slab
        compiler_params=pltpu.CompilerParams(
            dimension_semantics=("parallel",),                       # v7x megacore
            vmem_limit_bytes=_vmem_limit_bytes(batch_tile, L, E)),
    )


def multi_head_attention_forward(x, folded_params, n_heads, *, batch_tile=None):
    """x: (B, L, E) f32; folded_params: output of prepare_params()."""
    B, L, E = x.shape
    assert E % n_heads == 0, "embed_dim % n_heads != 0"
    if batch_tile is None:
        # Two fat grid steps when possible: amortizes per-step overhead on
        # single-TC chips (v5e/v6e) and keeps both v7x TensorCores busy.
        batch_tile = B // 2 if (B >= 2 and B % 2 == 0) else 1
    assert B % batch_tile == 0, "batch_tile must divide batch"

    args = (x, folded_params["W_qkv"], folded_params["b_qkv"],
            folded_params["W_out"], folded_params["b_out"])

    last_err = None
    for single_buffer in (True, False):     # fall back if pipeline_mode rejected
        try:
            fn = _mha_pallas_call(B, L, E, n_heads, batch_tile, x.dtype,
                                  single_buffer)
            return fn(*args)
        except Exception as e:              # pragma: no cover
            last_err = e
    raise last_err


# ----------------------------------------------------------------------------
# Pure-JAX reference (mirrors the PyTorch module, unfused, f32) for checking
# ----------------------------------------------------------------------------
def reference_forward(x, params, n_heads):
    B, L, E = x.shape
    hd = E // n_heads

    def lin(t, w, b):
        return t @ w.T + b

    q1 = lin(x, params["proj_q_w"], params["proj_q_b"])
    k1 = lin(x, params["proj_k_w"], params["proj_k_b"])
    v1 = lin(x, params["proj_v_w"], params["proj_v_b"])

    Wq, Wk, Wv = (params["in_proj_w"][0:E],
                  params["in_proj_w"][E:2 * E],
                  params["in_proj_w"][2 * E:3 * E])
    bq, bk, bv = (params["in_proj_b"][0:E],
                  params["in_proj_b"][E:2 * E],
                  params["in_proj_b"][2 * E:3 * E])
    q = lin(q1, Wq, bq)
    k = lin(k1, Wk, bk)
    v = lin(v1, Wv, bv)

    def heads(t):
        return t.reshape(B, L, n_heads, hd).transpose(0, 2, 1, 3)

    qh, kh, vh = heads(q), heads(k), heads(v)
    s = jnp.einsum("bhqd,bhkd->bhqk", qh, kh) / jnp.sqrt(jnp.float32(hd))
    p = jax.nn.softmax(s, axis=-1)
    o = jnp.einsum("bhqk,bhkd->bhqd", p, vh)
    o = o.transpose(0, 2, 1, 3).reshape(B, L, E)
    return lin(o, params["out_proj_w"], params["out_proj_b"])


# ----------------------------------------------------------------------------
# Deterministic parameter init (shapes from the module's __init__)
# ----------------------------------------------------------------------------
def init_params(key, embed_dim):
    E = embed_dim
    ks = jax.random.split(key, 10)
    s = 0.05
    return {
        "proj_q_w": s * jax.random.normal(ks[0], (E, E), jnp.float32),
        "proj_q_b": s * jax.random.normal(ks[1], (E,), jnp.float32),
        "proj_k_w": s * jax.random.normal(ks[2], (E, E), jnp.float32),
        "proj_k_b": s * jax.random.normal(ks[3], (E,), jnp.float32),
        "proj_v_w": s * jax.random.normal(ks[4], (E, E), jnp.float32),
        "proj_v_b": s * jax.random.normal(ks[5], (E,), jnp.float32),
        "in_proj_w": s * jax.random.normal(ks[6], (3 * E, E), jnp.float32),
        "in_proj_b": s * jax.random.normal(ks[7], (3 * E,), jnp.float32),
        "out_proj_w": s * jax.random.normal(ks[8], (E, E), jnp.float32),
        "out_proj_b": s * jax.random.normal(ks[9], (E,), jnp.float32),
    }


if __name__ == "__main__":
    # settings: N_HEADS=4, EMBED_DIM=32 (small, consistent with the module)
    N_HEADS = 4
    EMBED_DIM = 32
    B, L = 2, 8

    key = jax.random.PRNGKey(0)
    k_x, k_p = jax.random.split(key)
    x = jax.random.normal(k_x, (B, L, EMBED_DIM), jnp.float32)
    params = init_params(k_p, EMBED_DIM)

    # One-time folding (init-time work, hoisted out of the forward path).
    folded = prepare_params(params, N_HEADS)

    out = multi_head_attention_forward(x, folded, N_HEADS)
    out = jax.block_until_ready(out)

    ref = reference_forward(x, params, N_HEADS)

    assert out.shape == (B, L, EMBED_DIM)
    assert bool(jnp.all(jnp.isfinite(out)))
    assert jnp.allclose(out, ref, atol=2e-2, rtol=2e-2), "mismatch vs reference"
    print("KERNEL_OK")
</pallas_src>

<mosaic_0001>
module attributes {stable_mosaic.version = 11 : i64} {
  func.func @_fused_mha_kernel(%arg0: i32, %arg1: memref<1x8x32xf32, #tpu.memory_space<vmem>>, %arg2: memref<96x32xbf16, #tpu.memory_space<vmem>>, %arg3: memref<1x96xf32, #tpu.memory_space<vmem>>, %arg4: memref<32x32xbf16, #tpu.memory_space<vmem>>, %arg5: memref<1x32xf32, #tpu.memory_space<vmem>>, %arg6: memref<1x8x32xf32, #tpu.memory_space<vmem>>, %arg7: memref<8x32xf32, #tpu.memory_space<vmem>>) attributes {dimension_semantics = [#tpu.dimension_semantics<parallel>], iteration_bounds = array<i64: 2>, scalar_prefetch = 0 : i64, scratch_operands = 1 : i64, tpu.core_type = #tpu.core_type<tc>, window_params = [{transform_indices = @transform_0, window_bounds = array<i64: 1, 8, 32>}, {pipeline_mode = #tpu.pipeline_mode<synchronous>, transform_indices = @transform_1, window_bounds = array<i64: 96, 32>}, {pipeline_mode = #tpu.pipeline_mode<synchronous>, transform_indices = @transform_2, window_bounds = array<i64: 1, 96>}, {pipeline_mode = #tpu.pipeline_mode<synchronous>, transform_indices = @transform_3, window_bounds = array<i64: 32, 32>}, {pipeline_mode = #tpu.pipeline_mode<synchronous>, transform_indices = @transform_4, window_bounds = array<i64: 1, 32>}, {transform_indices = @transform_5, window_bounds = array<i64: 1, 8, 32>}]} {
    %c0 = arith.constant 0 : index
    %c0_0 = arith.constant 0 : index
    %0 = vector.load %arg2[%c0, %c0_0] : memref<96x32xbf16, #tpu.memory_space<vmem>>, vector<96x32xbf16>
    %c0_1 = arith.constant 0 : index
    %c0_2 = arith.constant 0 : index
    %1 = vector.load %arg4[%c0_1, %c0_2] : memref<32x32xbf16, #tpu.memory_space<vmem>>, vector<32x32xbf16>
    %c0_3 = arith.constant 0 : index
    %c0_4 = arith.constant 0 : index
    %2 = vector.load %arg3[%c0_3, %c0_4] : memref<1x96xf32, #tpu.memory_space<vmem>>, vector<1x96xf32>
    %c0_5 = arith.constant 0 : index
    %c0_6 = arith.constant 0 : index
    %3 = vector.load %arg5[%c0_5, %c0_6] : memref<1x32xf32, #tpu.memory_space<vmem>>, vector<1x32xf32>
    %c0_7 = arith.constant 0 : index
    %c0_8 = arith.constant 0 : index
    %c0_9 = arith.constant 0 : index
    %4 = vector.load %arg1[%c0_7, %c0_8, %c0_9] : memref<1x8x32xf32, #tpu.memory_space<vmem>>, vector<1x8x32xf32>
    %5 = vector.shape_cast %4 : vector<1x8x32xf32> to vector<8x32xf32>
    %6 = arith.truncf %5 : vector<8x32xf32> to vector<8x32xbf16>
    %cst = arith.constant dense<0.000000e+00> : vector<8x96xf32>
    %7 = tpu.matmul %6, %0, %cst {dimension_numbers = #tpu.dot_dimension_numbers<[1], [1], [0], [0], [0, 0, 1, 0], [], []>} : vector<8x32xbf16>, vector<96x32xbf16>, vector<8x96xf32> -> vector<8x96xf32>
    %8 = vector.broadcast %2 : vector<1x96xf32> to vector<8x96xf32>
    %9 = arith.addf %7, %8 : vector<8x96xf32>
    %10 = vector.extract_strided_slice %9 {offsets = [0, 0], sizes = [8, 8], strides = [1, 1]} : vector<8x96xf32> to vector<8x8xf32>
    %11 = arith.truncf %10 : vector<8x8xf32> to vector<8x8xbf16>
    %12 = vector.extract_strided_slice %9 {offsets = [0, 32], sizes = [8, 8], strides = [1, 1]} : vector<8x96xf32> to vector<8x8xf32>
    %13 = arith.truncf %12 : vector<8x8xf32> to vector<8x8xbf16>
    %14 = vector.extract_strided_slice %9 {offsets = [0, 64], sizes = [8, 8], strides = [1, 1]} : vector<8x96xf32> to vector<8x8xf32>
    %15 = arith.truncf %14 : vector<8x8xf32> to vector<8x8xbf16>
    %cst_10 = arith.constant dense<0.000000e+00> : vector<8x8xf32>
    %16 = tpu.matmul %11, %13, %cst_10 {dimension_numbers = #tpu.dot_dimension_numbers<[1], [1], [0], [0], [0, 0, 1, 0], [], []>} : vector<8x8xbf16>, vector<8x8xbf16>, vector<8x8xf32> -> vector<8x8xf32>
    %cst_11 = arith.constant dense<0xFF800000> : vector<8xf32>
    %17 = vector.multi_reduction <maximumf>, %16, %cst_11 [1] : vector<8x8xf32> to vector<8xf32>
    %18 = vector.shape_cast %17 : vector<8xf32> to vector<8x1xf32>
    %19 = vector.broadcast %18 : vector<8x1xf32> to vector<8x8xf32>
    %20 = arith.subf %16, %19 : vector<8x8xf32>
    %21 = math.exp %20 : vector<8x8xf32>
    %cst_12 = arith.constant dense<0.000000e+00> : vector<8xf32>
    %22 = vector.multi_reduction <add>, %21, %cst_12 [1] : vector<8x8xf32> to vector<8xf32>
    %23 = vector.shape_cast %22 : vector<8xf32> to vector<8x1xf32>
    %24 = tpu.reciprocal %23 {approx = true} : vector<8x1xf32> -> vector<8x1xf32>
    %25 = vector.broadcast %24 : vector<8x1xf32> to vector<8x8xf32>
    %26 = arith.mulf %21, %25 : vector<8x8xf32>
    %27 = arith.truncf %26 : vector<8x8xf32> to vector<8x8xbf16>
    %cst_13 = arith.constant dense<0.000000e+00> : vector<8x8xf32>
    %28 = tpu.matmul %27, %15, %cst_13 {dimension_numbers = #tpu.dot_dimension_numbers<[1], [0], [0], [1], [0, 0, 1, 1], [], []>} : vector<8x8xbf16>, vector<8x8xbf16>, vector<8x8xf32> -> vector<8x8xf32>
    %c0_14 = arith.constant 0 : index
    %c0_15 = arith.constant 0 : index
    %29 = vector.load %arg7[%c0_14, %c0_15] : memref<8x32xf32, #tpu.memory_space<vmem>>, vector<8x8xf32>
    tpu.vector_store %arg7[%c0_14, %c0_15], %28 {strides = array<i32>} : memref<8x32xf32, #tpu.memory_space<vmem>>, vector<8x8xf32>,
    %30 = vector.extract_strided_slice %9 {offsets = [0, 8], sizes = [8, 8], strides = [1, 1]} : vector<8x96xf32> to vector<8x8xf32>
    %31 = arith.truncf %30 : vector<8x8xf32> to vector<8x8xbf16>
    %32 = vector.extract_strided_slice %9 {offsets = [0, 40], sizes = [8, 8], strides = [1, 1]} : vector<8x96xf32> to vector<8x8xf32>
    %33 = arith.truncf %32 : vector<8x8xf32> to vector<8x8xbf16>
    %34 = vector.extract_strided_slice %9 {offsets = [0, 72], sizes = [8, 8], strides = [1, 1]} : vector<8x96xf32> to vector<8x8xf32>
    %35 = arith.truncf %34 : vector<8x8xf32> to vector<8x8xbf16>
    %cst_16 = arith.constant dense<0.000000e+00> : vector<8x8xf32>
    %36 = tpu.matmul %31, %33, %cst_16 {dimension_numbers = #tpu.dot_dimension_numbers<[1], [1], [0], [0], [0, 0, 1, 0], [], []>} : vector<8x8xbf16>, vector<8x8xbf16>, vector<8x8xf32> -> vector<8x8xf32>
    %cst_17 = arith.constant dense<0xFF800000> : vector<8xf32>
    %37 = vector.multi_reduction <maximumf>, %36, %cst_17 [1] : vector<8x8xf32> to vector<8xf32>
    %38 = vector.shape_cast %37 : vector<8xf32> to vector<8x1xf32>
    %39 = vector.broadcast %38 : vector<8x1xf32> to vector<8x8xf32>
    %40 = arith.subf %36, %39 : vector<8x8xf32>
    %41 = math.exp %40 : vector<8x8xf32>
    %cst_18 = arith.constant dense<0.000000e+00> : vector<8xf32>
    %42 = vector.multi_reduction <add>, %41, %cst_18 [1] : vector<8x8xf32> to vector<8xf32>
    %43 = vector.shape_cast %42 : vector<8xf32> to vector<8x1xf32>
    %44 = tpu.reciprocal %43 {approx = true} : vector<8x1xf32> -> vector<8x1xf32>
    %45 = vector.broadcast %44 : vector<8x1xf32> to vector<8x8xf32>
    %46 = arith.mulf %41, %45 : vector<8x8xf32>
    %47 = arith.truncf %46 : vector<8x8xf32> to vector<8x8xbf16>
    %cst_19 = arith.constant dense<0.000000e+00> : vector<8x8xf32>
    %48 = tpu.matmul %47, %35, %cst_19 {dimension_numbers = #tpu.dot_dimension_numbers<[1], [0], [0], [1], [0, 0, 1, 1], [], []>} : vector<8x8xbf16>, vector<8x8xbf16>, vector<8x8xf32> -> vector<8x8xf32>
    %c0_20 = arith.constant 0 : index
    %c8 = arith.constant 8 : index
    %49 = vector.load %arg7[%c0_20, %c8] : memref<8x32xf32, #tpu.memory_space<vmem>>, vector<8x8xf32>
    tpu.vector_store %arg7[%c0_20, %c8], %48 {strides = array<i32>} : memref<8x32xf32, #tpu.memory_space<vmem>>, vector<8x8xf32>,
    %50 = vector.extract_strided_slice %9 {offsets = [0, 16], sizes = [8, 8], strides = [1, 1]} : vector<8x96xf32> to vector<8x8xf32>
    %51 = arith.truncf %50 : vector<8x8xf32> to vector<8x8xbf16>
    %52 = vector.extract_strided_slice %9 {offsets = [0, 48], sizes = [8, 8], strides = [1, 1]} : vector<8x96xf32> to vector<8x8xf32>
    %53 = arith.truncf %52 : vector<8x8xf32> to vector<8x8xbf16>
    %54 = vector.extract_strided_slice %9 {offsets = [0, 80], sizes = [8, 8], strides = [1, 1]} : vector<8x96xf32> to vector<8x8xf32>
    %55 = arith.truncf %54 : vector<8x8xf32> to vector<8x8xbf16>
    %cst_21 = arith.constant dense<0.000000e+00> : vector<8x8xf32>
    %56 = tpu.matmul %51, %53, %cst_21 {dimension_numbers = #tpu.dot_dimension_numbers<[1], [1], [0], [0], [0, 0, 1, 0], [], []>} : vector<8x8xbf16>, vector<8x8xbf16>, vector<8x8xf32> -> vector<8x8xf32>
    %cst_22 = arith.constant dense<0xFF800000> : vector<8xf32>
    %57 = vector.multi_reduction <maximumf>, %56, %cst_22 [1] : vector<8x8xf32> to vector<8xf32>
    %58 = vector.shape_cast %57 : vector<8xf32> to vector<8x1xf32>
    %59 = vector.broadcast %58 : vector<8x1xf32> to vector<8x8xf32>
    %60 = arith.subf %56, %59 : vector<8x8xf32>
    %61 = math.exp %60 : vector<8x8xf32>
    %cst_23 = arith.constant dense<0.000000e+00> : vector<8xf32>
    %62 = vector.multi_reduction <add>, %61, %cst_23 [1] : vector<8x8xf32> to vector<8xf32>
    %63 = vector.shape_cast %62 : vector<8xf32> to vector<8x1xf32>
    %64 = tpu.reciprocal %63 {approx = true} : vector<8x1xf32> -> vector<8x1xf32>
    %65 = vector.broadcast %64 : vector<8x1xf32> to vector<8x8xf32>
    %66 = arith.mulf %61, %65 : vector<8x8xf32>
    %67 = arith.truncf %66 : vector<8x8xf32> to vector<8x8xbf16>
    %cst_24 = arith.constant dense<0.000000e+00> : vector<8x8xf32>
    %68 = tpu.matmul %67, %55, %cst_24 {dimension_numbers = #tpu.dot_dimension_numbers<[1], [0], [0], [1], [0, 0, 1, 1], [], []>} : vector<8x8xbf16>, vector<8x8xbf16>, vector<8x8xf32> -> vector<8x8xf32>
    %c0_25 = arith.constant 0 : index
    %c16 = arith.constant 16 : index
    %69 = vector.load %arg7[%c0_25, %c16] : memref<8x32xf32, #tpu.memory_space<vmem>>, vector<8x8xf32>
    tpu.vector_store %arg7[%c0_25, %c16], %68 {strides = array<i32>} : memref<8x32xf32, #tpu.memory_space<vmem>>, vector<8x8xf32>,
    %70 = vector.extract_strided_slice %9 {offsets = [0, 24], sizes = [8, 8], strides = [1, 1]} : vector<8x96xf32> to vector<8x8xf32>
    %71 = arith.truncf %70 : vector<8x8xf32> to vector<8x8xbf16>
    %72 = vector.extract_strided_slice %9 {offsets = [0, 56], sizes = [8, 8], strides = [1, 1]} : vector<8x96xf32> to vector<8x8xf32>
    %73 = arith.truncf %72 : vector<8x8xf32> to vector<8x8xbf16>
    %74 = vector.extract_strided_slice %9 {offsets = [0, 88], sizes = [8, 8], strides = [1, 1]} : vector<8x96xf32> to vector<8x8xf32>
    %75 = arith.truncf %74 : vector<8x8xf32> to vector<8x8xbf16>
    %cst_26 = arith.constant dense<0.000000e+00> : vector<8x8xf32>
    %76 = tpu.matmul %71, %73, %cst_26 {dimension_numbers = #tpu.dot_dimension_numbers<[1], [1], [0], [0], [0, 0, 1, 0], [], []>} : vector<8x8xbf16>, vector<8x8xbf16>, vector<8x8xf32> -> vector<8x8xf32>
    %cst_27 = arith.constant dense<0xFF800000> : vector<8xf32>
    %77 = vector.multi_reduction <maximumf>, %76, %cst_27 [1] : vector<8x8xf32> to vector<8xf32>
    %78 = vector.shape_cast %77 : vector<8xf32> to vector<8x1xf32>
    %79 = vector.broadcast %78 : vector<8x1xf32> to vector<8x8xf32>
    %80 = arith.subf %76, %79 : vector<8x8xf32>
    %81 = math.exp %80 : vector<8x8xf32>
    %cst_28 = arith.constant dense<0.000000e+00> : vector<8xf32>
    %82 = vector.multi_reduction <add>, %81, %cst_28 [1] : vector<8x8xf32> to vector<8xf32>
    %83 = vector.shape_cast %82 : vector<8xf32> to vector<8x1xf32>
    %84 = tpu.reciprocal %83 {approx = true} : vector<8x1xf32> -> vector<8x1xf32>
    %85 = vector.broadcast %84 : vector<8x1xf32> to vector<8x8xf32>
    %86 = arith.mulf %81, %85 : vector<8x8xf32>
    %87 = arith.truncf %86 : vector<8x8xf32> to vector<8x8xbf16>
    %cst_29 = arith.constant dense<0.000000e+00> : vector<8x8xf32>
    %88 = tpu.matmul %87, %75, %cst_29 {dimension_numbers = #tpu.dot_dimension_numbers<[1], [0], [0], [1], [0, 0, 1, 1], [], []>} : vector<8x8xbf16>, vector<8x8xbf16>, vector<8x8xf32> -> vector<8x8xf32>
    %c0_30 = arith.constant 0 : index
    %c24 = arith.constant 24 : index
    %89 = vector.load %arg7[%c0_30, %c24] : memref<8x32xf32, #tpu.memory_space<vmem>>, vector<8x8xf32>
    tpu.vector_store %arg7[%c0_30, %c24], %88 {strides = array<i32>} : memref<8x32xf32, #tpu.memory_space<vmem>>, vector<8x8xf32>,
    %c0_31 = arith.constant 0 : index
    %c0_32 = arith.constant 0 : index
    %90 = vector.load %arg7[%c0_31, %c0_32] : memref<8x32xf32, #tpu.memory_space<vmem>>, vector<8x32xf32>
    %91 = arith.truncf %90 : vector<8x32xf32> to vector<8x32xbf16>
    %cst_33 = arith.constant dense<0.000000e+00> : vector<8x32xf32>
    %92 = tpu.matmul %91, %1, %cst_33 {dimension_numbers = #tpu.dot_dimension_numbers<[1], [1], [0], [0], [0, 0, 1, 0], [], []>} : vector<8x32xbf16>, vector<32x32xbf16>, vector<8x32xf32> -> vector<8x32xf32>
    %93 = vector.broadcast %3 : vector<1x32xf32> to vector<8x32xf32>
    %94 = arith.addf %92, %93 : vector<8x32xf32>
    %c0_34 = arith.constant 0 : index
    %c0_35 = arith.constant 0 : index
    %c0_36 = arith.constant 0 : index
    %95 = vector.load %arg6[%c0_34, %c0_35, %c0_36] : memref<1x8x32xf32, #tpu.memory_space<vmem>>, vector<1x8x32xf32>
    %96 = vector.shape_cast %95 : vector<1x8x32xf32> to vector<8x32xf32>
    %97 = vector.shape_cast %94 : vector<8x32xf32> to vector<1x8x32xf32>
    tpu.vector_store %arg6[%c0_34, %c0_35, %c0_36], %97 {strides = array<i32>} : memref<1x8x32xf32, #tpu.memory_space<vmem>>, vector<1x8x32xf32>,
    return
  }
  func.func @transform_0(%arg0: i32) -> (i32, i32, i32) {
    %c0_i32 = arith.constant 0 : i32
    %c0_i32_0 = arith.constant 0 : i32
    %c0_i32_1 = arith.constant 0 : i32
    return %arg0, %c0_i32, %c0_i32_0 : i32, i32, i32
  }
  func.func @transform_1(%arg0: i32) -> (i32, i32) {
    %c0_i32 = arith.constant 0 : i32
    %c0_i32_0 = arith.constant 0 : i32
    %c0_i32_1 = arith.constant 0 : i32
    return %c0_i32, %c0_i32_0 : i32, i32
  }
  func.func @transform_2(%arg0: i32) -> (i32, i32) {
    %c0_i32 = arith.constant 0 : i32
    %c0_i32_0 = arith.constant 0 : i32
    %c0_i32_1 = arith.constant 0 : i32
    return %c0_i32, %c0_i32_0 : i32, i32
  }
  func.func @transform_3(%arg0: i32) -> (i32, i32) {
    %c0_i32 = arith.constant 0 : i32
    %c0_i32_0 = arith.constant 0 : i32
    %c0_i32_1 = arith.constant 0 : i32
    return %c0_i32, %c0_i32_0 : i32, i32
  }
  func.func @transform_4(%arg0: i32) -> (i32, i32) {
    %c0_i32 = arith.constant 0 : i32
    %c0_i32_0 = arith.constant 0 : i32
    %c0_i32_1 = arith.constant 0 : i32
    return %c0_i32, %c0_i32_0 : i32, i32
  }
  func.func @transform_5(%arg0: i32) -> (i32, i32, i32) {
    %c0_i32 = arith.constant 0 : i32
    %c0_i32_0 = arith.constant 0 : i32
    %c0_i32_1 = arith.constant 0 : i32
    return %arg0, %c0_i32, %c0_i32_0 : i32, i32, i32
  }
}

module attributes {stable_mosaic.version = 11 : i64} {
  func.func @_fused_mha_kernel(%arg0: i32, %arg1: memref<1x8x32xf32, #tpu.memory_space<vmem>>, %arg2: memref<96x32xbf16, #tpu.memory_space<vmem>>, %arg3: memref<1x96xf32, #tpu.memory_space<vmem>>, %arg4: memref<32x32xbf16, #tpu.memory_space<vmem>>, %arg5: memref<1x32xf32, #tpu.memory_space<vmem>>, %arg6: memref<1x8x32xf32, #tpu.memory_space<vmem>>, %arg7: memref<8x32xf32, #tpu.memory_space<vmem>>) attributes {dimension_semantics = [#tpu.dimension_semantics<parallel>], iteration_bounds = array<i64: 2>, scalar_prefetch = 0 : i64, scratch_operands = 1 : i64, tpu.core_type = #tpu.core_type<tc>, window_params = [{transform_indices = @transform_0, window_bounds = array<i64: 1, 8, 32>}, {pipeline_mode = #tpu.pipeline_mode<synchronous>, transform_indices = @transform_1, window_bounds = array<i64: 96, 32>}, {pipeline_mode = #tpu.pipeline_mode<synchronous>, transform_indices = @transform_2, window_bounds = array<i64: 1, 96>}, {pipeline_mode = #tpu.pipeline_mode<synchronous>, transform_indices = @transform_3, window_bounds = array<i64: 32, 32>}, {pipeline_mode = #tpu.pipeline_mode<synchronous>, transform_indices = @transform_4, window_bounds = array<i64: 1, 32>}, {transform_indices = @transform_5, window_bounds = array<i64: 1, 8, 32>}]} {
    %c0 = arith.constant 0 : index
    %c0_0 = arith.constant 0 : index
    %0 = vector.load %arg2[%c0, %c0_0] : memref<96x32xbf16, #tpu.memory_space<vmem>>, vector<96x32xbf16>
    %c0_1 = arith.constant 0 : index
    %c0_2 = arith.constant 0 : index
    %1 = vector.load %arg4[%c0_1, %c0_2] : memref<32x32xbf16, #tpu.memory_space<vmem>>, vector<32x32xbf16>
    %c0_3 = arith.constant 0 : index
    %c0_4 = arith.constant 0 : index
    %2 = vector.load %arg3[%c0_3, %c0_4] : memref<1x96xf32, #tpu.memory_space<vmem>>, vector<1x96xf32>
    %c0_5 = arith.constant 0 : index
    %c0_6 = arith.constant 0 : index
    %3 = vector.load %arg5[%c0_5, %c0_6] : memref<1x32xf32, #tpu.memory_space<vmem>>, vector<1x32xf32>
    %c0_7 = arith.constant 0 : index
    %c0_8 = arith.constant 0 : index
    %c0_9 = arith.constant 0 : index
    %4 = vector.load %arg1[%c0_7, %c0_8, %c0_9] : memref<1x8x32xf32, #tpu.memory_space<vmem>>, vector<1x8x32xf32>
    %5 = vector.shape_cast %4 : vector<1x8x32xf32> to vector<8x32xf32>
    %6 = arith.truncf %5 : vector<8x32xf32> to vector<8x32xbf16>
    %cst = arith.constant dense<0.000000e+00> : vector<8x96xf32>
    %7 = tpu.matmul %6, %0, %cst {dimension_numbers = #tpu.dot_dimension_numbers<[1], [1], [0], [0], [0, 0, 1, 0], [], []>} : vector<8x32xbf16>, vector<96x32xbf16>, vector<8x96xf32> -> vector<8x96xf32>
    %8 = vector.broadcast %2 : vector<1x96xf32> to vector<8x96xf32>
    %9 = arith.addf %7, %8 : vector<8x96xf32>
    %10 = vector.extract_strided_slice %9 {offsets = [0, 0], sizes = [8, 8], strides = [1, 1]} : vector<8x96xf32> to vector<8x8xf32>
    %11 = arith.truncf %10 : vector<8x8xf32> to vector<8x8xbf16>
    %12 = vector.extract_strided_slice %9 {offsets = [0, 32], sizes = [8, 8], strides = [1, 1]} : vector<8x96xf32> to vector<8x8xf32>
    %13 = arith.truncf %12 : vector<8x8xf32> to vector<8x8xbf16>
    %14 = vector.extract_strided_slice %9 {offsets = [0, 64], sizes = [8, 8], strides = [1, 1]} : vector<8x96xf32> to vector<8x8xf32>
    %15 = arith.truncf %14 : vector<8x8xf32> to vector<8x8xbf16>
    %cst_10 = arith.constant dense<0.000000e+00> : vector<8x8xf32>
    %16 = tpu.matmul %11, %13, %cst_10 {dimension_numbers = #tpu.dot_dimension_numbers<[1], [1], [0], [0], [0, 0, 1, 0], [], []>} : vector<8x8xbf16>, vector<8x8xbf16>, vector<8x8xf32> -> vector<8x8xf32>
    %cst_11 = arith.constant dense<0xFF800000> : vector<8xf32>
    %17 = vector.multi_reduction <maximumf>, %16, %cst_11 [1] : vector<8x8xf32> to vector<8xf32>
    %18 = vector.shape_cast %17 : vector<8xf32> to vector<8x1xf32>
    %19 = vector.broadcast %18 : vector<8x1xf32> to vector<8x8xf32>
    %20 = arith.subf %16, %19 : vector<8x8xf32>
    %21 = math.exp %20 : vector<8x8xf32>
    %cst_12 = arith.constant dense<0.000000e+00> : vector<8xf32>
    %22 = vector.multi_reduction <add>, %21, %cst_12 [1] : vector<8x8xf32> to vector<8xf32>
    %23 = vector.shape_cast %22 : vector<8xf32> to vector<8x1xf32>
    %24 = tpu.reciprocal %23 {approx = true} : vector<8x1xf32> -> vector<8x1xf32>
    %25 = vector.broadcast %24 : vector<8x1xf32> to vector<8x8xf32>
    %26 = arith.mulf %21, %25 : vector<8x8xf32>
    %27 = arith.truncf %26 : vector<8x8xf32> to vector<8x8xbf16>
    %cst_13 = arith.constant dense<0.000000e+00> : vector<8x8xf32>
    %28 = tpu.matmul %27, %15, %cst_13 {dimension_numbers = #tpu.dot_dimension_numbers<[1], [0], [0], [1], [0, 0, 1, 1], [], []>} : vector<8x8xbf16>, vector<8x8xbf16>, vector<8x8xf32> -> vector<8x8xf32>
    %c0_14 = arith.constant 0 : index
    %c0_15 = arith.constant 0 : index
    %29 = vector.load %arg7[%c0_14, %c0_15] : memref<8x32xf32, #tpu.memory_space<vmem>>, vector<8x8xf32>
    tpu.vector_store %arg7[%c0_14, %c0_15], %28 {strides = array<i32>} : memref<8x32xf32, #tpu.memory_space<vmem>>, vector<8x8xf32>,
    %30 = vector.extract_strided_slice %9 {offsets = [0, 8], sizes = [8, 8], strides = [1, 1]} : vector<8x96xf32> to vector<8x8xf32>
    %31 = arith.truncf %30 : vector<8x8xf32> to vector<8x8xbf16>
    %32 = vector.extract_strided_slice %9 {offsets = [0, 40], sizes = [8, 8], strides = [1, 1]} : vector<8x96xf32> to vector<8x8xf32>
    %33 = arith.truncf %32 : vector<8x8xf32> to vector<8x8xbf16>
    %34 = vector.extract_strided_slice %9 {offsets = [0, 72], sizes = [8, 8], strides = [1, 1]} : vector<8x96xf32> to vector<8x8xf32>
    %35 = arith.truncf %34 : vector<8x8xf32> to vector<8x8xbf16>
    %cst_16 = arith.constant dense<0.000000e+00> : vector<8x8xf32>
    %36 = tpu.matmul %31, %33, %cst_16 {dimension_numbers = #tpu.dot_dimension_numbers<[1], [1], [0], [0], [0, 0, 1, 0], [], []>} : vector<8x8xbf16>, vector<8x8xbf16>, vector<8x8xf32> -> vector<8x8xf32>
    %cst_17 = arith.constant dense<0xFF800000> : vector<8xf32>
    %37 = vector.multi_reduction <maximumf>, %36, %cst_17 [1] : vector<8x8xf32> to vector<8xf32>
    %38 = vector.shape_cast %37 : vector<8xf32> to vector<8x1xf32>
    %39 = vector.broadcast %38 : vector<8x1xf32> to vector<8x8xf32>
    %40 = arith.subf %36, %39 : vector<8x8xf32>
    %41 = math.exp %40 : vector<8x8xf32>
    %cst_18 = arith.constant dense<0.000000e+00> : vector<8xf32>
    %42 = vector.multi_reduction <add>, %41, %cst_18 [1] : vector<8x8xf32> to vector<8xf32>
    %43 = vector.shape_cast %42 : vector<8xf32> to vector<8x1xf32>
    %44 = tpu.reciprocal %43 {approx = true} : vector<8x1xf32> -> vector<8x1xf32>
    %45 = vector.broadcast %44 : vector<8x1xf32> to vector<8x8xf32>
    %46 = arith.mulf %41, %45 : vector<8x8xf32>
    %47 = arith.truncf %46 : vector<8x8xf32> to vector<8x8xbf16>
    %cst_19 = arith.constant dense<0.000000e+00> : vector<8x8xf32>
    %48 = tpu.matmul %47, %35, %cst_19 {dimension_numbers = #tpu.dot_dimension_numbers<[1], [0], [0], [1], [0, 0, 1, 1], [], []>} : vector<8x8xbf16>, vector<8x8xbf16>, vector<8x8xf32> -> vector<8x8xf32>
    %c0_20 = arith.constant 0 : index
    %c8 = arith.constant 8 : index
    %49 = vector.load %arg7[%c0_20, %c8] : memref<8x32xf32, #tpu.memory_space<vmem>>, vector<8x8xf32>
    tpu.vector_store %arg7[%c0_20, %c8], %48 {strides = array<i32>} : memref<8x32xf32, #tpu.memory_space<vmem>>, vector<8x8xf32>,
    %50 = vector.extract_strided_slice %9 {offsets = [0, 16], sizes = [8, 8], strides = [1, 1]} : vector<8x96xf32> to vector<8x8xf32>
    %51 = arith.truncf %50 : vector<8x8xf32> to vector<8x8xbf16>
    %52 = vector.extract_strided_slice %9 {offsets = [0, 48], sizes = [8, 8], strides = [1, 1]} : vector<8x96xf32> to vector<8x8xf32>
    %53 = arith.truncf %52 : vector<8x8xf32> to vector<8x8xbf16>
    %54 = vector.extract_strided_slice %9 {offsets = [0, 80], sizes = [8, 8], strides = [1, 1]} : vector<8x96xf32> to vector<8x8xf32>
    %55 = arith.truncf %54 : vector<8x8xf32> to vector<8x8xbf16>
    %cst_21 = arith.constant dense<0.000000e+00> : vector<8x8xf32>
    %56 = tpu.matmul %51, %53, %cst_21 {dimension_numbers = #tpu.dot_dimension_numbers<[1], [1], [0], [0], [0, 0, 1, 0], [], []>} : vector<8x8xbf16>, vector<8x8xbf16>, vector<8x8xf32> -> vector<8x8xf32>
    %cst_22 = arith.constant dense<0xFF800000> : vector<8xf32>
    %57 = vector.multi_reduction <maximumf>, %56, %cst_22 [1] : vector<8x8xf32> to vector<8xf32>
    %58 = vector.shape_cast %57 : vector<8xf32> to vector<8x1xf32>
    %59 = vector.broadcast %58 : vector<8x1xf32> to vector<8x8xf32>
    %60 = arith.subf %56, %59 : vector<8x8xf32>
    %61 = math.exp %60 : vector<8x8xf32>
    %cst_23 = arith.constant dense<0.000000e+00> : vector<8xf32>
    %62 = vector.multi_reduction <add>, %61, %cst_23 [1] : vector<8x8xf32> to vector<8xf32>
    %63 = vector.shape_cast %62 : vector<8xf32> to vector<8x1xf32>
    %64 = tpu.reciprocal %63 {approx = true} : vector<8x1xf32> -> vector<8x1xf32>
    %65 = vector.broadcast %64 : vector<8x1xf32> to vector<8x8xf32>
    %66 = arith.mulf %61, %65 : vector<8x8xf32>
    %67 = arith.truncf %66 : vector<8x8xf32> to vector<8x8xbf16>
    %cst_24 = arith.constant dense<0.000000e+00> : vector<8x8xf32>
    %68 = tpu.matmul %67, %55, %cst_24 {dimension_numbers = #tpu.dot_dimension_numbers<[1], [0], [0], [1], [0, 0, 1, 1], [], []>} : vector<8x8xbf16>, vector<8x8xbf16>, vector<8x8xf32> -> vector<8x8xf32>
    %c0_25 = arith.constant 0 : index
    %c16 = arith.constant 16 : index
    %69 = vector.load %arg7[%c0_25, %c16] : memref<8x32xf32, #tpu.memory_space<vmem>>, vector<8x8xf32>
    tpu.vector_store %arg7[%c0_25, %c16], %68 {strides = array<i32>} : memref<8x32xf32, #tpu.memory_space<vmem>>, vector<8x8xf32>,
    %70 = vector.extract_strided_slice %9 {offsets = [0, 24], sizes = [8, 8], strides = [1, 1]} : vector<8x96xf32> to vector<8x8xf32>
    %71 = arith.truncf %70 : vector<8x8xf32> to vector<8x8xbf16>
    %72 = vector.extract_strided_slice %9 {offsets = [0, 56], sizes = [8, 8], strides = [1, 1]} : vector<8x96xf32> to vector<8x8xf32>
    %73 = arith.truncf %72 : vector<8x8xf32> to vector<8x8xbf16>
    %74 = vector.extract_strided_slice %9 {offsets = [0, 88], sizes = [8, 8], strides = [1, 1]} : vector<8x96xf32> to vector<8x8xf32>
    %75 = arith.truncf %74 : vector<8x8xf32> to vector<8x8xbf16>
    %cst_26 = arith.constant dense<0.000000e+00> : vector<8x8xf32>
    %76 = tpu.matmul %71, %73, %cst_26 {dimension_numbers = #tpu.dot_dimension_numbers<[1], [1], [0], [0], [0, 0, 1, 0], [], []>} : vector<8x8xbf16>, vector<8x8xbf16>, vector<8x8xf32> -> vector<8x8xf32>
    %cst_27 = arith.constant dense<0xFF800000> : vector<8xf32>
    %77 = vector.multi_reduction <maximumf>, %76, %cst_27 [1] : vector<8x8xf32> to vector<8xf32>
    %78 = vector.shape_cast %77 : vector<8xf32> to vector<8x1xf32>
    %79 = vector.broadcast %78 : vector<8x1xf32> to vector<8x8xf32>
    %80 = arith.subf %76, %79 : vector<8x8xf32>
    %81 = math.exp %80 : vector<8x8xf32>
    %cst_28 = arith.constant dense<0.000000e+00> : vector<8xf32>
    %82 = vector.multi_reduction <add>, %81, %cst_28 [1] : vector<8x8xf32> to vector<8xf32>
    %83 = vector.shape_cast %82 : vector<8xf32> to vector<8x1xf32>
    %84 = tpu.reciprocal %83 {approx = true} : vector<8x1xf32> -> vector<8x1xf32>
    %85 = vector.broadcast %84 : vector<8x1xf32> to vector<8x8xf32>
    %86 = arith.mulf %81, %85 : vector<8x8xf32>
    %87 = arith.truncf %86 : vector<8x8xf32> to vector<8x8xbf16>
    %cst_29 = arith.constant dense<0.000000e+00> : vector<8x8xf32>
    %88 = tpu.matmul %87, %75, %cst_29 {dimension_numbers = #tpu.dot_dimension_numbers<[1], [0], [0], [1], [0, 0, 1, 1], [], []>} : vector<8x8xbf16>, vector<8x8xbf16>, vector<8x8xf32> -> vector<8x8xf32>
    %c0_30 = arith.constant 0 : index
    %c24 = arith.constant 24 : index
    %89 = vector.load %arg7[%c0_30, %c24] : memref<8x32xf32, #tpu.memory_space<vmem>>, vector<8x8xf32>
    tpu.vector_store %arg7[%c0_30, %c24], %88 {strides = array<i32>} : memref<8x32xf32, #tpu.memory_space<vmem>>, vector<8x8xf32>,
    %c0_31 = arith.constant 0 : index
    %c0_32 = arith.constant 0 : index
    %90 = vector.load %arg7[%c0_31, %c0_32] : memref<8x32xf32, #tpu.memory_space<vmem>>, vector<8x32xf32>
    %91 = arith.truncf %90 : vector<8x32xf32> to vector<8x32xbf16>
    %cst_33 = arith.constant dense<0.000000e+00> : vector<8x32xf32>
    %92 = tpu.matmul %91, %1, %cst_33 {dimension_numbers = #tpu.dot_dimension_numbers<[1], [1], [0], [0], [0, 0, 1, 0], [], []>} : vector<8x32xbf16>, vector<32x32xbf16>, vector<8x32xf32> -> vector<8x32xf32>
    %93 = vector.broadcast %3 : vector<1x32xf32> to vector<8x32xf32>
    %94 = arith.addf %92, %93 : vector<8x32xf32>
    %c0_34 = arith.constant 0 : index
    %c0_35 = arith.constant 0 : index
    %c0_36 = arith.constant 0 : index
    %95 = vector.load %arg6[%c0_34, %c0_35, %c0_36] : memref<1x8x32xf32, #tpu.memory_space<vmem>>, vector<1x8x32xf32>
    %96 = vector.shape_cast %95 : vector<1x8x32xf32> to vector<8x32xf32>
    %97 = vector.shape_cast %94 : vector<8x32xf32> to vector<1x8x32xf32>
    tpu.vector_store %arg6[%c0_34, %c0_35, %c0_36], %97 {strides = array<i32>} : memref<1x8x32xf32, #tpu.memory_space<vmem>>, vector<1x8x32xf32>,
    return
  }
  func.func @transform_0(%arg0: i32) -> (i32, i32, i32) {
    %c0_i32 = arith.constant 0 : i32
    %c0_i32_0 = arith.constant 0 : i32
    %c0_i32_1 = arith.constant 0 : i32
    return %arg0, %c0_i32, %c0_i32_0 : i32, i32, i32
  }
  func.func @transform_1(%arg0: i32) -> (i32, i32) {
    %c0_i32 = arith.constant 0 : i32
    %c0_i32_0 = arith.constant 0 : i32
    %c0_i32_1 = arith.constant 0 : i32
    return %c0_i32, %c0_i32_0 : i32, i32
  }
  func.func @transform_2(%arg0: i32) -> (i32, i32) {
    %c0_i32 = arith.constant 0 : i32
    %c0_i32_0 = arith.constant 0 : i32
    %c0_i32_1 = arith.constant 0 : i32
    return %c0_i32, %c0_i32_0 : i32, i32
  }
  func.func @transform_3(%arg0: i32) -> (i32, i32) {
    %c0_i32 = arith.constant 0 : i32
    %c0_i32_0 = arith.constant 0 : i32
    %c0_i32_1 = arith.constant 0 : i32
    return %c0_i32, %c0_i32_0 : i32, i32
  }
  func.func @transform_4(%arg0: i32) -> (i32, i32) {
    %c0_i32 = arith.constant 0 : i32
    %c0_i32_0 = arith.constant 0 : i32
    %c0_i32_1 = arith.constant 0 : i32
    return %c0_i32, %c0_i32_0 : i32, i32
  }
  func.func @transform_5(%arg0: i32) -> (i32, i32, i32) {
    %c0_i32 = arith.constant 0 : i32
    %c0_i32_0 = arith.constant 0 : i32
    %c0_i32_1 = arith.constant 0 : i32
    return %arg0, %c0_i32, %c0_i32_0 : i32, i32, i32
  }
}

</mosaic_0001>

<bundles_post_ra>
// kernel: tpu_custom_call.1
= control target key start
LH: loop header
LB: loop body
LE: loop exit
PB: predicated region body
PF: predicated region fallthrough
CT: control target
= control target key end

     0   :  { %10 = vsyncpa [#allocation4], 0  ;;  %s1475_s0 = inlined_call_operand.vmem [shape: f32[2,8,32], index: 0, kind: input, shape index: {}]   ;;  %s1476_s1 = inlined_call_operand.vmem [shape: bf16[96,32], index: 1, kind: input, shape index: {}]   ;;  %s1477_s2 = inlined_call_operand.vmem [shape: f32[1,96], index: 2, kind: input, shape index: {}]   ;;  %s1478_s3 = inlined_call_operand.vmem [shape: bf16[32,32], index: 3, kind: input, shape index: {}]   ;;  %s1479_s4 = inlined_call_operand.vmem [shape: f32[1,32], index: 4, kind: input, shape index: {}]   ;;  %s1480_s5 = inlined_call_operand.hbm [shape: f32[2,8,32], index: 5, kind: output, shape index: {}]  }
   0x1   :  { %12 = vsyncpa [#allocation4 + $0x1], 0  ;;  %s1259_s18 = smov 0   ;;  %s1261_s19 = smov 0  }
   0x2   :  { %s1263_s20 = smov 0   ;;  %s1265_s21 = smov 0  }
   0x3 LB: > { %s1280_s22 = sadd.s32 4294967295, %s1210_s21   ;;  %s941_s23 = sadd.s32 4294967294, %s1210_s21   ;;  %s1210_s21 = sphi %s1265_s21, %s1486_s21   ;;  %s1206_s20 = sphi %s1263_s20, %s1485_s20   ;;  %s1202_s19 = sphi %s1261_s19, %s1484_s19   ;;  %s1198_s18 = sphi %s1259_s18, %s1483_s18  }
   0x4   : > { %s1284_s24 = sadd.s32 1, %s1210_s21   ;;  %s135_s25 = sadd.s32 1, %s1206_s20 }
   0x5   : > { %s132_s26 = ssub.s32 %s1210_s21, %s1284_s24  ;;  %p145_p0 = scmp.ne.s32.totalorder %s1206_s20, %s1202_s19 }
   0x6   : > { %p133_p1 = scmp.eq.s32.totalorder %s132_s26, 0  ;;  %p146_p2 = scmp.eq.s32.totalorder %s1280_s22, 1 }
   0x7   : > { %p151_p3 = scmp.ne.s32.totalorder %s1202_s19, %s1198_s18  ;;  %p152_p4 = scmp.eq.s32.totalorder %s941_s23, 1 }
   0x8   : > { %s1295_s27 = scalar_select %p133_p1, %s1206_s20, %s135_s25  }
   0x9   : > { %p1297_p5 = por %p146_p2, %p145_p0  ;;  %p1301_p6 = por %p152_p4, %p151_p3 }
   0xa   : > { %p944_p7 = scmp.ge.s32.totalorder %s1210_s21, 1  ;;  %p189_p8 = scmp.lt.s32.totalorder %s1210_s21, 3 }
   0xc   : > { %p190_p9 = pnand %p944_p7, %p189_p8 }
   0xd   : > { %v1124_v0 = vld [vmem:[%s1476_s1] sm:$0xff] (!%p190_p9)   ;;  %v1212_v1 = vmov (!%p190_p9), 0.0   ;;  %vm277_vm0 = vcmask (!%p190_p9), 261120   ;;  %v1125_v3 = vld [vmem:[%s1476_s1 + $0x8] sm:$0xff] (!%p190_p9)   ;;  %vm1213_vm1 = vmmov (!%p190_p9), 0   ;;  %v1126_v5 = vld [vmem:[%s1476_s1 + $0x10] sm:$0xff] (!%p190_p9)  }
   0xe   : > { %193 = sbr.rel (%p190_p9) target bundleno = 3102 (0xc1e), region = 40  ;;  %997 = vmatprep.subr.bf16.mxu0 (!%p190_p9), %v1212_v1  ;;  %1013 = vmatprep.subr.bf16.mxu1 (!%p190_p9), %v1212_v1  ;;  %v282_v2 = vsel (!%p190_p9), %vm277_vm0, %v1124_v0, 0  ;;  %v285_v4 = vsel (!%p190_p9), %vm277_vm0, %v1125_v3, 0  ;;  %v288_v6 = vsel (!%p190_p9), %vm277_vm0, %v1126_v5, 0  ;;  %v1127_v7 = vld [vmem:[%s1476_s1 + $0x18] sm:$0xff] (!%p190_p9)   ;;  %v1128_v9 = vld [vmem:[%s1476_s1 + $0x20] sm:$0xff] (!%p190_p9)  }
   0xf   : > { %998 = vmatpush3.bf16.xpose.msra.mxu0 (!%p190_p9), %v282_v2  ;;  %1009 = vmatprep.mubr.msk.bf16.mxu0 (!%p190_p9), %vm1213_vm1, %v1212_v1  ;;  %v291_v8 = vsel (!%p190_p9), %vm277_vm0, %v1127_v7, 0  ;;  %p216_p10 = scmp.lt.s32.totalorder (!%p190_p9), %s1280_s22, 1  ;;  %v294_v10 = vsel (!%p190_p9), %vm277_vm0, %v1128_v9, 0  ;;  %v1129_v11 = vld [vmem:[%s1476_s1 + $0x28] sm:$0xff] (!%p190_p9)   ;;  %v947_v15 = vld [vmem:[%s1477_s2] ss:$0 sm:$0xff] (!%p190_p9) }
  0x10   : > { %999 = vmatprep.subr.bf16.mxu0 (!%p190_p9), %v1212_v1  ;;  %1015 = vmatprep.mubr.msk.bf16.mxu1 (!%p190_p9), %vm1213_vm1, %v1212_v1  ;;  %v297_v12 = vsel (!%p190_p9), %vm277_vm0, %v1129_v11, 0  ;;  %s1214_s8 = smov (!%p190_p9), 64   ;;  %s1215_s9 = smov (!%p190_p9), 96   ;;  %vm343_vm2 = vcmask (!%p190_p9), 64512   ;;  %vm407_vm3 = vcmask (!%p190_p9), 1043456   ;;  %vm566_vm4 = vcmask (!%p190_p9), 130112  }
  0x11   : > { %s1216_s10 = smov (!%p190_p9), 56   ;;  %s1217_s11 = smov (!%p190_p9), 88   ;;  %vm682_vm5 = vcmask (!%p190_p9), 195712   ;;  %vm798_vm6 = vcmask (!%p190_p9), 261312  }
  0x12   : > { %s1218_s12 = smov (!%p190_p9), 120   ;;  %s1219_s13 = smov (!%p190_p9), 80  }
  0x13   : > { %s1220_s14 = smov (!%p190_p9), 112   ;;  %s1222_s16 = smov (!%p190_p9), 72  }
  0x14   : > { %s1223_s17 = smov (!%p190_p9), 104   ;;  %s1225_s25 = smov (!%p190_p9), 8  }
  0x15   : > { %s217_s15 = scalar_select %p216_p10, %s1280_s22, 1 }
  0x16   : > { %s1226_s26 = smov 16  }
  0x17   : > { %1000 = vmatpush3.bf16.xpose.msra.mxu0 %v285_v4  ;;  %s946_s23 = sshll.u32 %s217_s15, 3  ;;  %s1221_s15 = smov 48  }
  0x18   : > { %1001 = vmatprep.subr.bf16.mxu0 %v1212_v1  ;;  %s219_s30 = scalar_lea.vmem %s1475_s0, %s946_s23  ;;  %s1224_s23 = smov 40  }
  0x19   : > { %v239_v13 = vld [vmem:[%s219_s30] sm:$0xff]  ;;  %s1228_s30 = smov [#allocation3]  }
  0x1a   : > { %v240_v14 = vpack.c.bf16 %v239_v13, %v239_v13  ;;  %s1152_s6 = sshll.u32 %s1228_s30, 4  ;;  %s1153_s6 = int_to_ptr.vmem [resolvable:$false] %s1152_s6 }
  0x1b   : > { %s1154_s7 = scalar_lea.vmem %s1153_s6, 256 }
  0x1f   : > { %1002 = vmatpush3.bf16.xpose.msra.mxu0 %v288_v6 }
  0x20   : > { %1003 = vmatprep.subr.bf16.mxu0 %v1212_v1 }
  0x27   : > { %1004 = vmatpush3.bf16.xpose.msra.mxu0 %v291_v8 }
  0x28   : > { %1005 = vmatprep.subr.bf16.mxu0 %v1212_v1 }
  0x2f   : > { %1006 = vmatpush3.bf16.xpose.msra.mxu0 %v294_v10 }
  0x30   : > { %1007 = vmatprep.subr.bf16.mxu0 %v1212_v1 }
  0x37   : > { %1008 = vmatpush3.bf16.xpose.msra.mxu0 %v297_v12 }
  0x38   : > { %1061 = vmatprep.subr.bf16.mxu0 %v1212_v1 }
  0x3e   : > { %1010 = vmatmul.mubr.msk.bf16.vlgmr.msra.gmra.mrb[0].mxu0 %vm277_vm0, %v240_v14 }
  0x3f   : > { %1065 = vmatprep.mubr.msk.bf16.mxu0 %vm1213_vm1, %v1212_v1 }
 0x111   : > { %v333_v16 = vpop.f32.mrb[0].mxu0 }
 0x112   : > { %v334_v17 = vadd.f32 %v947_v15, %v333_v16  ;;  %v1011_v18 = vpop.f32.mrb[1].mxu0 }
 0x113   : > { %v336_v19 = vpop.f32.mrb[2].mxu0 }
 0x114   : > { %v1354_v20 = vpack.c.bf16 %v334_v17, %v334_v17  ;;  %v1012_v21 = vpop.f32.mrb[3].mxu0 }
 0x116   : > { %402 = vrot.lane.b32.xlu1 %v1354_v20, %s1214_s8  ;;  %341 = vrot.lane.b32.xlu0 %v1354_v20, %s1215_s9  ;;  %s1227_s9 = smov 24  }
 0x188   : > { %v342_v22 = vpop.permute.xlu0 %341  ;;  %v403_v24 = vpop.permute.xlu1 %402 }
 0x189   : > { %v348_v23 = vsel %vm343_vm2, %v342_v22, 0  ;;  %v409_v25 = vsel %vm407_vm3, %v403_v24, 0 }
 0x18a   : > { %1014 = vmatpush3.bf16.xpose.msra.mxu1 %v348_v23 }
 0x18b   : > { %1019 = vmatprep.subr.bf16.mxu1 %v1212_v1 }
 0x191   : > { %1016 = vmatmul.mubr.msk.bf16.vlgmr.msra.gmra.mrb[0].mxu1 %vm343_vm2, %v1354_v20 }
 0x192   : > { %1020 = vmatpush3.bf16.msra.mxu1 %v409_v25  ;;  %1021 = vmatprep.mubr.msk.bf16.mxu1 %vm1213_vm1, %v1212_v1 }
 0x193   : > { %1025 = vmatprep.subr.bf16.mxu1 %v1212_v1 }
 0x264   : > { %v384_v26 = vpop.f32.mrb[0].mxu1 }
 0x265   : > { %v1017_v27 = vpop.f32.mrb[1].mxu1  ;;  %v390_v28 = vsel %vm343_vm2, %v384_v26, -inf }
 0x266   : > { %391 = vmax.xlane.f32.xlu0 %v390_v28  ;;  %v387_v29 = vpop.f32.mrb[2].mxu1 }
 0x267   : > { %v1018_v30 = vpop.f32.mrb[3].mxu1 }
 0x27c   : > { %514 = vrot.lane.b32.xlu0 %v1354_v20, %s1216_s10  ;;  %s213_s10 = sand.u32 1, %s1202_s19  }
 0x2f3   : > { %v392_v31 = vpop.xlane.xlu0 %391 }
 0x2f4   : > { %v393_v32 = vsub.f32 %v384_v26, %v392_v31 }
 0x2f6   : > { %v394_v33 = vmul.f32 1.442695, %v393_v32 }
 0x2f7   : > { %v515_v42 = vpop.permute.xlu0 %514 }
 0x2f8   : > { %1132 = vpow2.f32 %v394_v33  ;;  %v520_v44 = vsel %vm407_vm3, %v515_v42, 0 }
 0x302   : > { %v1133_v34 = vpop.eup %1132 }
 0x303   : > { %v396_v35 = vsel %vm343_vm2, %v1133_v34, 0.0 }
 0x304   : > { %397 = vadd.xlane.f32.xlu1 %v396_v35 }
 0x315   : > { %454 = vrot.lane.b32.xlu1 %v1354_v20, %s1217_s11  ;;  %s945_s11 = sshll.u32 %s213_s10, 3 }
 0x319   : > { %452 = vrot.lane.b32.xlu1 %v1354_v20, %s1218_s12 }
 0x391   : > { %v398_v36 = vpop.xlane.xlu1 %397 }
 0x392   : > { %1134 = vrcp.f32 %v398_v36 }
 0x395   : > { %v455_v39 = vpop.permute.xlu1 %454 }
 0x396   : > { %v460_v41 = vsel %vm343_vm2, %v455_v39, 0 }
 0x399   : > { %v453_v43 = vpop.permute.xlu1 %452 }
 0x39c   : > { %v1135_v37 = vpop.eup %1134 }
 0x39d   : > { %v400_v38 = vmul.f32 %v1135_v37, %v1133_v34 }
 0x39f   : > { %v401_v40 = vpack.c.bf16 %v400_v38, %v400_v38 }
 0x3a1   : > { %1022 = vmatmul.mubr.msk.bf16.vlgmr.msra.gmra.mrb[4].mxu1 %vm343_vm2, %v401_v40 }
 0x3a2   : > { %1026 = vmatpush3.bf16.xpose.msra.mxu1 %v460_v41  ;;  %1027 = vmatprep.mubr.msk.bf16.mxu1 %vm1213_vm1, %v1212_v1 }
 0x3a3   : > { %1031 = vmatprep.subr.bf16.mxu1 %v1212_v1 }
 0x3a9   : > { %1028 = vmatmul.mubr.msk.bf16.vlgmr.msra.gmra.mrb[8].mxu1 %vm343_vm2, %v453_v43 }
 0x3aa   : > { %1032 = vmatpush3.bf16.msra.mxu1 %v520_v44  ;;  %1033 = vmatprep.mubr.msk.bf16.mxu1 %vm1213_vm1, %v1212_v1 }
 0x3ab   : > { %1037 = vmatprep.subr.bf16.mxu1 %v1212_v1 }
 0x474   : > { %v445_v45 = vpop.f32.mrb[4].mxu1 }
 0x475   : > { %451 = vst.msk [vmem:[#allocation2] sm:$0xff] %vm343_vm2, %v445_v45  ;;  %v1023_v46 = vpop.f32.mrb[5].mxu1 }
 0x476   : > { %v448_v47 = vpop.f32.mrb[6].mxu1 }
 0x477   : > { %v1024_v48 = vpop.f32.mrb[7].mxu1 }
 0x47c   : > { %v496_v49 = vpop.f32.mrb[8].mxu1 }
 0x47d   : > { %v1029_v50 = vpop.f32.mrb[9].mxu1  ;;  %v502_v51 = vsel %vm343_vm2, %v496_v49, -inf }
 0x47e   : > { %503 = vmax.xlane.f32.xlu1 %v502_v51  ;;  %v499_v52 = vpop.f32.mrb[10].mxu1  ;;  %v1131_v50 = vld [vmem:[%s1478_s3 + $0x8] sm:$0xff]  }
 0x47f   : > { %v1030_v53 = vpop.f32.mrb[11].mxu1  ;;  %v825_v51 = vsel %vm277_vm0, %v1131_v50, 0 }
 0x50b   : > { %v504_v54 = vpop.xlane.xlu1 %503 }
 0x50c   : > { %v505_v55 = vsub.f32 %v496_v49, %v504_v54 }
 0x50e   : > { %v506_v56 = vmul.f32 1.442695, %v505_v55 }
 0x510   : > { %1136 = vpow2.f32 %v506_v56 }
 0x51a   : > { %v1137_v57 = vpop.eup %1136 }
 0x51b   : > { %v508_v58 = vsel %vm343_vm2, %v1137_v57, 0.0 }
 0x51c   : > { %509 = vadd.xlane.f32.xlu0 %v508_v58  ;;  %v963_v58 = vld [vmem:[%s1479_s4] ss:$0 sm:$0xff] }
 0x532   : > { %570 = vrot.lane.b32.xlu0 %v1354_v20, %s1219_s13 }
 0x536   : > { %568 = vrot.lane.b32.xlu0 %v1354_v20, %s1220_s14  ;;  %s968_s14 = sshll.u32 %s1280_s22, 7  ;;  %s869_s22 = scalar_lea.sflag [#allocation4], %s213_s10 }
 0x5a9   : > { %v510_v59 = vpop.xlane.xlu0 %509 }
 0x5aa   : > { %1138 = vrcp.f32 %v510_v59 }
 0x5ad   : > { %v571_v62 = vpop.permute.xlu0 %570 }
 0x5ae   : > { %v576_v0 = vsel %vm343_vm2, %v571_v62, 0 }
 0x5b1   : > { %v569_v2 = vpop.permute.xlu0 %568 }
 0x5b4   : > { %v1139_v60 = vpop.eup %1138 }
 0x5b5   : > { %v512_v61 = vmul.f32 %v1139_v60, %v1137_v57 }
 0x5b7   : > { %v513_v63 = vpack.c.bf16 %v512_v61, %v512_v61 }
 0x5b9   : > { %1034 = vmatmul.mubr.msk.bf16.vlgmr.msra.gmra.mrb[12].mxu1 %vm343_vm2, %v513_v63 }
 0x5ba   : > { %1038 = vmatpush3.bf16.xpose.msra.mxu1 %v576_v0  ;;  %1039 = vmatprep.mubr.msk.bf16.mxu1 %vm1213_vm1, %v1212_v1 }
 0x5bb   : > { %1043 = vmatprep.subr.bf16.mxu1 %v1212_v1 }
 0x5c1   : > { %1040 = vmatmul.mubr.msk.bf16.vlgmr.msra.gmra.mrb[16].mxu1 %vm343_vm2, %v569_v2 }
 0x5c2   : > { %1045 = vmatprep.mubr.msk.bf16.mxu1 %vm1213_vm1, %v1212_v1 }
 0x68c   : > { %v556_v3 = vpop.f32.mrb[12].mxu1 }
 0x68d   : > { %v1035_v4 = vpop.f32.mrb[13].mxu1 }
 0x68e   : > { %v559_v5 = vpop.f32.mrb[14].mxu1 }
 0x68f   : > { %v1036_v6 = vpop.f32.mrb[15].mxu1 }
 0x694   : > { %v612_v7 = vpop.f32.mrb[16].mxu1 }
 0x695   : > { %v1041_v8 = vpop.f32.mrb[17].mxu1  ;;  %v618_v9 = vsel %vm343_vm2, %v612_v7, -inf }
 0x696   : > { %619 = vmax.xlane.f32.xlu1 %v618_v9  ;;  %v615_v10 = vpop.f32.mrb[18].mxu1 }
 0x697   : > { %v1042_v11 = vpop.f32.mrb[19].mxu1 }
 0x6a7   : > { %630 = vrot.lane.b32.xlu1 %v1354_v20, %s1221_s15  ;;  %s215_s15 = scalar_lea.vmem [#allocation3], %s945_s11 }
 0x6ab   : > { %686 = vrot.lane.b32.xlu1 %v1354_v20, %s1222_s16  ;;  %s882_s16 = sshll.u32 %s215_s15, 4  ;;  %s1434_s16 = int_to_ptr.vmem [resolvable:$true] %s882_s16 }
 0x6ac   : > { %p1155_p0 = scmp.lt.s32.totalorder %s1434_s16, %s1153_s6 }
 0x6af   : > { %684 = vrot.lane.b32.xlu1 %v1354_v20, %s1223_s17 }
 0x723   : > { %v620_v12 = vpop.xlane.xlu1 %619 }
 0x724   : > { %v621_v13 = vsub.f32 %v612_v7, %v620_v12 }
 0x726   : > { %v622_v14 = vmul.f32 1.442695, %v621_v13 }
 0x727   : > { %v631_v15 = vpop.permute.xlu1 %630 }
 0x728   : > { %1140 = vpow2.f32 %v622_v14  ;;  %v636_v16 = vsel %vm407_vm3, %v631_v15, 0 }
 0x729   : > { %1044 = vmatpush3.bf16.msra.mxu1 %v636_v16 }
 0x72a   : > { %1049 = vmatprep.subr.bf16.mxu1 %v1212_v1 }
 0x72b   : > { %v687_v23 = vpop.permute.xlu1 %686 }
 0x72c   : > { %v692_v25 = vsel %vm343_vm2, %v687_v23, 0 }
 0x72f   : > { %v685_v26 = vpop.permute.xlu1 %684 }
 0x732   : > { %v1141_v17 = vpop.eup %1140 }
 0x733   : > { %v624_v18 = vsel %vm343_vm2, %v1141_v17, 0.0 }
 0x734   : > { %625 = vadd.xlane.f32.xlu0 %v624_v18 }
 0x7c1   : > { %v626_v19 = vpop.xlane.xlu0 %625 }
 0x7c2   : > { %1142 = vrcp.f32 %v626_v19 }
 0x7cc   : > { %v1143_v21 = vpop.eup %1142 }
 0x7cd   : > { %v628_v22 = vmul.f32 %v1143_v21, %v1141_v17 }
 0x7cf   : > { %v629_v24 = vpack.c.bf16 %v628_v22, %v628_v22 }
 0x7d1   : > { %1046 = vmatmul.mubr.msk.bf16.vlgmr.msra.gmra.mrb[20].mxu1 %vm343_vm2, %v629_v24 }
 0x7d2   : > { %1050 = vmatpush3.bf16.xpose.msra.mxu1 %v692_v25  ;;  %1051 = vmatprep.mubr.msk.bf16.mxu1 %vm1213_vm1, %v1212_v1 }
 0x7d3   : > { %1055 = vmatprep.subr.bf16.mxu1 %v1212_v1 }
 0x7d9   : > { %1052 = vmatmul.mubr.msk.bf16.vlgmr.msra.gmra.mrb[24].mxu1 %vm343_vm2, %v685_v26 }
 0x7da   : > { %1057 = vmatprep.mubr.msk.bf16.mxu1 %vm1213_vm1, %v1212_v1 }
 0x8a4   : > { %v672_v27 = vpop.f32.mrb[20].mxu1 }
 0x8a5   : > { %v1047_v28 = vpop.f32.mrb[21].mxu1 }
 0x8a6   : > { %v675_v29 = vpop.f32.mrb[22].mxu1 }
 0x8a7   : > { %v1048_v30 = vpop.f32.mrb[23].mxu1 }
 0x8ac   : > { %v728_v31 = vpop.f32.mrb[24].mxu1 }
 0x8ad   : > { %v1053_v32 = vpop.f32.mrb[25].mxu1  ;;  %v734_v33 = vsel %vm343_vm2, %v728_v31, -inf }
 0x8ae   : > { %735 = vmax.xlane.f32.xlu1 %v734_v33  ;;  %v731_v34 = vpop.f32.mrb[26].mxu1 }
 0x8af   : > { %v1054_v35 = vpop.f32.mrb[27].mxu1 }
 0x93b   : > { %v736_v36 = vpop.xlane.xlu1 %735 }
 0x93c   : > { %v737_v37 = vsub.f32 %v728_v31, %v736_v36 }
 0x93e   : > { %v738_v38 = vmul.f32 1.442695, %v737_v37 }
 0x940   : > { %1144 = vpow2.f32 %v738_v38 }
 0x94a   : > { %v1145_v39 = vpop.eup %1144 }
 0x94b   : > { %v740_v40 = vsel %vm343_vm2, %v1145_v39, 0.0 }
 0x94c   : > { %741 = vadd.xlane.f32.xlu0 %v740_v40 }
 0x962   : > { %746 = vrot.lane.b32.xlu0 %v1354_v20, %s1224_s23  ;;  %v1130_v20 = vld [vmem:[%s1478_s3] sm:$0xff]  }
 0x963   : > { %v822_v49 = vsel %vm277_vm0, %v1130_v20, 0 }
 0x964   : > { %1062 = vmatpush3.bf16.xpose.msra.mxu0 %v822_v49 }
 0x965   : > { %1063 = vmatprep.subr.bf16.mxu0 %v1212_v1 }
 0x966   : > { %563 = vrot.lane.b32.xlu0 %v556_v3, %s1225_s25  ;;  %s1432_s25 = scalar_lea.hbm %s1480_s5, %s968_s14 }
 0x96a   : > { %679 = vrot.lane.b32.xlu0 %v672_v27, %s1226_s26  ;;  %s1148_s26 = scalar_lea.vmem %s1434_s16, 128 }
 0x96b   : > { %p1149_p11 = scmp.ne.s32.totalorder %s1434_s16, %s1148_s26  ;;  %p1156_p1 = scmp.lt.s32.totalorder %s1154_s7, %s1148_s26 }
 0x96c   : > { %1064 = vmatpush3.bf16.xpose.msra.mxu0 %v825_v51 }
 0x96d   : > { %p1150_p12 = pnand %p1149_p11, %p1297_p5  ;;  %p1157_p2 = por %p1156_p1, %p1155_p0 }
 0x96f   : > { %p1151_p13 = pneg %p1150_p12 }
 0x971   : > { %p1158_p3 = pnand %p1157_p2, %p1151_p13 }
 0x9d9   : > { %v742_v41 = vpop.xlane.xlu0 %741 }
 0x9da   : > { %1146 = vrcp.f32 %v742_v41 }
 0x9dd   : > { %v747_v42 = vpop.permute.xlu0 %746 }
 0x9de   : > { %v752_v43 = vsel %vm407_vm3, %v747_v42, 0 }
 0x9df   : > { %1056 = vmatpush3.bf16.msra.mxu1 %v752_v43 }
 0x9e1   : > { %v564_v44 = vpop.permute.xlu0 %563 }
 0x9e2   : > { %567 = vst.msk [vmem:[#allocation2] sm:$0xff] %vm566_vm4, %v564_v44 }
 0x9e4   : > { %v1147_v45 = vpop.eup %1146 }
 0x9e5   : > { %v744_v46 = vmul.f32 %v1147_v45, %v1145_v39  ;;  %v680_v47 = vpop.permute.xlu0 %679 }
 0x9e6   : > { %683 = vst.msk [vmem:[#allocation2] sm:$0xff] %vm682_vm5, %v680_v47 }
 0x9e7   : > { %v745_v48 = vpack.c.bf16 %v744_v46, %v744_v46 }
 0x9e9   : > { %1058 = vmatmul.mubr.msk.bf16.vlgmr.msra.gmra.mrb[28].mxu1 %vm343_vm2, %v745_v48 }
 0xabc   : > { %v788_v52 = vpop.f32.mrb[28].mxu1 }
 0xabd   : > { %795 = vrot.lane.b32.xlu1 %v788_v52, %s1227_s9  ;;  %v1059_v53 = vpop.f32.mrb[29].mxu1 }
 0xabe   : > { %v791_v54 = vpop.f32.mrb[30].mxu1 }
 0xabf   : > { %v1060_v55 = vpop.f32.mrb[31].mxu1 }
 0xb2f   : > { %v796_v56 = vpop.permute.xlu1 %795 }
 0xb30   : > { %799 = vst.msk [vmem:[#allocation2] sm:$0xff] %vm798_vm6, %v796_v56 }
 0xb37   : > { %v800_v57 = vld [vmem:[#allocation2] sm:$0xff] }
 0xb38   : > { %v801_v1 = vpack.c.bf16 %v800_v57, %v800_v57 }
 0xb3a   : > { %1066 = vmatmul.mubr.msk.bf16.vlgmr.msra.gmra.mrb[4].mxu0 %vm277_vm0, %v801_v1 }
 0xc0d   : > { %v861_v59 = vpop.f32.mrb[4].mxu0 }
 0xc0e   : > { %v862_v60 = vadd.f32 %v963_v58, %v861_v59  ;;  %v1067_v61 = vpop.f32.mrb[5].mxu0 }
 0xc0f   : > { %v864_v62 = vpop.f32.mrb[6].mxu0 }
 0xc10   : > { %v1068_v63 = vpop.f32.mrb[7].mxu0  ;;  %867 = vst.msk [vmem:[%s215_s15] sm:$0xff] %vm277_vm0, %v862_v60 }
 0xc11   : > { %1161 = shalt.err (!%p1158_p3)
}
 0xc12   : > { %s1162_s8 = scalar_lea.hbm %s1432_s25, 128  ;;  %s1166_s11 = scalar_lea.hbm %s1480_s5, 256 }
 0xc13   : > { %p1163_p4 = scmp.ne.s32.totalorder %s1432_s25, %s1162_s8  ;;  %p1167_p9 = scmp.lt.u32.totalorder %s1432_s25, %s1480_s5 }
 0xc14   : > { %p1168_p10 = scmp.lt.u32.totalorder %s1166_s11, %s1162_s8  ;;  %p1170_p12 = scmp.lt.u32.totalorder %s1162_s8, %s1432_s25 }
 0xc15   : > { %p1164_p7 = pnand %p1163_p4, %p1297_p5 }
 0xc16   : > { %p1169_p11 = por %p1168_p10, %p1167_p9 }
 0xc17   : > { %p1165_p8 = pneg %p1164_p7 }
 0xc18   : > { %p1171_p13 = por %p1170_p12, %p1169_p11 }
 0xc1a   : > { %p1172_p0 = pnand %p1171_p13, %p1165_p8 }
 0xc1c   : > { %1175 = shalt.err (!%p1172_p0)
}
 0xc1d   : > { %1069 = dma.vmem_to_hbm [thread:$0]  (%p1297_p5), %s1434_s16, 128, %s1432_s25, %s869_s22  }
 0xc1e PF: > { %p1075_p1 = scmp.ge.s32.totalorder %s1210_s21, 2  ;;  %s894_s14 = sand.u32 1, %s1198_s18  }
 0xc1f   : > { %s895_s15 = scalar_lea.sflag [#allocation4], %s894_s14 }
 0xc20   : > { %p1072_p2 = pnand %p1075_p1, %p1301_p6 }
 0xc22   : > { %1193 = dma.done.wait (!%p1072_p2), %s895_s15, 128  }
 0xc23   : > { %1195 = vsyncadd (!%p1072_p2), %s895_s15, 4294967168  ;;  %p15_p3 = scmp.ge.s32.totalorder %s1284_s24, 4   ;;  %s1483_s18 = smov %s1202_s19 }
 0xc24   : > { %s1484_s19 = smov %s1206_s20  ;;  %s1485_s20 = smov %s1295_s27 }
 0xc25   : > { %s1486_s21 = smov %s1284_s24  ;;  %17 = sbr.rel (!%p15_p3) target bundleno = 3 (0x3), region = 75 }
 0xc2c   :  { %900 = vsyncpa [#allocation4], 1 }
 0xc2d   :  { %902 = vsyncpa [#allocation4 + $0x1], 1 }

// kernel: tpu_custom_call.1
= control target key start
LH: loop header
LB: loop body
LE: loop exit
PB: predicated region body
PF: predicated region fallthrough
CT: control target
= control target key end

     0   :  { %10 = vsyncpa [#allocation4], 0  ;;  %s1475_s0 = inlined_call_operand.vmem [shape: f32[2,8,32], index: 0, kind: input, shape index: {}]   ;;  %s1476_s1 = inlined_call_operand.vmem [shape: bf16[96,32], index: 1, kind: input, shape index: {}]   ;;  %s1477_s2 = inlined_call_operand.vmem [shape: f32[1,96], index: 2, kind: input, shape index: {}]   ;;  %s1478_s3 = inlined_call_operand.vmem [shape: bf16[32,32], index: 3, kind: input, shape index: {}]   ;;  %s1479_s4 = inlined_call_operand.vmem [shape: f32[1,32], index: 4, kind: input, shape index: {}]   ;;  %s1480_s5 = inlined_call_operand.hbm [shape: f32[2,8,32], index: 5, kind: output, shape index: {}]  }
   0x1   :  { %12 = vsyncpa [#allocation4 + $0x1], 0  ;;  %s1259_s18 = smov 0   ;;  %s1261_s19 = smov 0  }
   0x2   :  { %s1263_s20 = smov 0   ;;  %s1265_s21 = smov 0  }
   0x3 LB: > { %s1280_s22 = sadd.s32 4294967295, %s1210_s21   ;;  %s941_s23 = sadd.s32 4294967294, %s1210_s21   ;;  %s1210_s21 = sphi %s1265_s21, %s1486_s21   ;;  %s1206_s20 = sphi %s1263_s20, %s1485_s20   ;;  %s1202_s19 = sphi %s1261_s19, %s1484_s19   ;;  %s1198_s18 = sphi %s1259_s18, %s1483_s18  }
   0x4   : > { %s1284_s24 = sadd.s32 1, %s1210_s21   ;;  %s135_s25 = sadd.s32 1, %s1206_s20 }
   0x5   : > { %s132_s26 = ssub.s32 %s1210_s21, %s1284_s24  ;;  %p145_p0 = scmp.ne.s32.totalorder %s1206_s20, %s1202_s19 }
   0x6   : > { %p133_p1 = scmp.eq.s32.totalorder %s132_s26, 0  ;;  %p146_p2 = scmp.eq.s32.totalorder %s1280_s22, 1 }
   0x7   : > { %p151_p3 = scmp.ne.s32.totalorder %s1202_s19, %s1198_s18  ;;  %p152_p4 = scmp.eq.s32.totalorder %s941_s23, 1 }
   0x8   : > { %s1295_s27 = scalar_select %p133_p1, %s1206_s20, %s135_s25  }
   0x9   : > { %p1297_p5 = por %p146_p2, %p145_p0  ;;  %p1301_p6 = por %p152_p4, %p151_p3 }
   0xa   : > { %p944_p7 = scmp.ge.s32.totalorder %s1210_s21, 1  ;;  %p189_p8 = scmp.lt.s32.totalorder %s1210_s21, 3 }
   0xc   : > { %p190_p9 = pnand %p944_p7, %p189_p8 }
   0xd   : > { %v1124_v0 = vld [vmem:[%s1476_s1] sm:$0xff] (!%p190_p9)   ;;  %v1212_v1 = vmov (!%p190_p9), 0.0   ;;  %vm277_vm0 = vcmask (!%p190_p9), 261120   ;;  %v1125_v3 = vld [vmem:[%s1476_s1 + $0x8] sm:$0xff] (!%p190_p9)   ;;  %vm1213_vm1 = vmmov (!%p190_p9), 0   ;;  %v1126_v5 = vld [vmem:[%s1476_s1 + $0x10] sm:$0xff] (!%p190_p9)  }
   0xe   : > { %193 = sbr.rel (%p190_p9) target bundleno = 3102 (0xc1e), region = 40  ;;  %997 = vmatprep.subr.bf16.mxu0 (!%p190_p9), %v1212_v1  ;;  %1013 = vmatprep.subr.bf16.mxu1 (!%p190_p9), %v1212_v1  ;;  %v282_v2 = vsel (!%p190_p9), %vm277_vm0, %v1124_v0, 0  ;;  %v285_v4 = vsel (!%p190_p9), %vm277_vm0, %v1125_v3, 0  ;;  %v288_v6 = vsel (!%p190_p9), %vm277_vm0, %v1126_v5, 0  ;;  %v1127_v7 = vld [vmem:[%s1476_s1 + $0x18] sm:$0xff] (!%p190_p9)   ;;  %v1128_v9 = vld [vmem:[%s1476_s1 + $0x20] sm:$0xff] (!%p190_p9)  }
   0xf   : > { %998 = vmatpush3.bf16.xpose.msra.mxu0 (!%p190_p9), %v282_v2  ;;  %1009 = vmatprep.mubr.msk.bf16.mxu0 (!%p190_p9), %vm1213_vm1, %v1212_v1  ;;  %v291_v8 = vsel (!%p190_p9), %vm277_vm0, %v1127_v7, 0  ;;  %p216_p10 = scmp.lt.s32.totalorder (!%p190_p9), %s1280_s22, 1  ;;  %v294_v10 = vsel (!%p190_p9), %vm277_vm0, %v1128_v9, 0  ;;  %v1129_v11 = vld [vmem:[%s1476_s1 + $0x28] sm:$0xff] (!%p190_p9)   ;;  %v947_v15 = vld [vmem:[%s1477_s2] ss:$0 sm:$0xff] (!%p190_p9) }
  0x10   : > { %999 = vmatprep.subr.bf16.mxu0 (!%p190_p9), %v1212_v1  ;;  %1015 = vmatprep.mubr.msk.bf16.mxu1 (!%p190_p9), %vm1213_vm1, %v1212_v1  ;;  %v297_v12 = vsel (!%p190_p9), %vm277_vm0, %v1129_v11, 0  ;;  %s1214_s8 = smov (!%p190_p9), 64   ;;  %s1215_s9 = smov (!%p190_p9), 96   ;;  %vm343_vm2 = vcmask (!%p190_p9), 64512   ;;  %vm407_vm3 = vcmask (!%p190_p9), 1043456   ;;  %vm566_vm4 = vcmask (!%p190_p9), 130112  }
  0x11   : > { %s1216_s10 = smov (!%p190_p9), 56   ;;  %s1217_s11 = smov (!%p190_p9), 88   ;;  %vm682_vm5 = vcmask (!%p190_p9), 195712   ;;  %vm798_vm6 = vcmask (!%p190_p9), 261312  }
  0x12   : > { %s1218_s12 = smov (!%p190_p9), 120   ;;  %s1219_s13 = smov (!%p190_p9), 80  }
  0x13   : > { %s1220_s14 = smov (!%p190_p9), 112   ;;  %s1222_s16 = smov (!%p190_p9), 72  }
  0x14   : > { %s1223_s17 = smov (!%p190_p9), 104   ;;  %s1225_s25 = smov (!%p190_p9), 8  }
  0x15   : > { %s217_s15 = scalar_select %p216_p10, %s1280_s22, 1 }
  0x16   : > { %s1226_s26 = smov 16  }
  0x17   : > { %1000 = vmatpush3.bf16.xpose.msra.mxu0 %v285_v4  ;;  %s946_s23 = sshll.u32 %s217_s15, 3  ;;  %s1221_s15 = smov 48  }
  0x18   : > { %1001 = vmatprep.subr.bf16.mxu0 %v1212_v1  ;;  %s219_s30 = scalar_lea.vmem %s1475_s0, %s946_s23  ;;  %s1224_s23 = smov 40  }
  0x19   : > { %v239_v13 = vld [vmem:[%s219_s30] sm:$0xff]  ;;  %s1228_s30 = smov [#allocation3]  }
  0x1a   : > { %v240_v14 = vpack.c.bf16 %v239_v13, %v239_v13  ;;  %s1152_s6 = sshll.u32 %s1228_s30, 4  ;;  %s1153_s6 = int_to_ptr.vmem [resolvable:$false] %s1152_s6 }
  0x1b   : > { %s1154_s7 = scalar_lea.vmem %s1153_s6, 256 }
  0x1f   : > { %1002 = vmatpush3.bf16.xpose.msra.mxu0 %v288_v6 }
  0x20   : > { %1003 = vmatprep.subr.bf16.mxu0 %v1212_v1 }
  0x27   : > { %1004 = vmatpush3.bf16.xpose.msra.mxu0 %v291_v8 }
  0x28   : > { %1005 = vmatprep.subr.bf16.mxu0 %v1212_v1 }
  0x2f   : > { %1006 = vmatpush3.bf16.xpose.msra.mxu0 %v294_v10 }
  0x30   : > { %1007 = vmatprep.subr.bf16.mxu0 %v1212_v1 }
  0x37   : > { %1008 = vmatpush3.bf16.xpose.msra.mxu0 %v297_v12 }
  0x38   : > { %1061 = vmatprep.subr.bf16.mxu0 %v1212_v1 }
  0x3e   : > { %1010 = vmatmul.mubr.msk.bf16.vlgmr.msra.gmra.mrb[0].mxu0 %vm277_vm0, %v240_v14 }
  0x3f   : > { %1065 = vmatprep.mubr.msk.bf16.mxu0 %vm1213_vm1, %v1212_v1 }
 0x111   : > { %v333_v16 = vpop.f32.mrb[0].mxu0 }
 0x112   : > { %v334_v17 = vadd.f32 %v947_v15, %v333_v16  ;;  %v1011_v18 = vpop.f32.mrb[1].mxu0 }
 0x113   : > { %v336_v19 = vpop.f32.mrb[2].mxu0 }
 0x114   : > { %v1354_v20 = vpack.c.bf16 %v334_v17, %v334_v17  ;;  %v1012_v21 = vpop.f32.mrb[3].mxu0 }
 0x116   : > { %402 = vrot.lane.b32.xlu1 %v1354_v20, %s1214_s8  ;;  %341 = vrot.lane.b32.xlu0 %v1354_v20, %s1215_s9  ;;  %s1227_s9 = smov 24  }
 0x188   : > { %v342_v22 = vpop.permute.xlu0 %341  ;;  %v403_v24 = vpop.permute.xlu1 %402 }
 0x189   : > { %v348_v23 = vsel %vm343_vm2, %v342_v22, 0  ;;  %v409_v25 = vsel %vm407_vm3, %v403_v24, 0 }
 0x18a   : > { %1014 = vmatpush3.bf16.xpose.msra.mxu1 %v348_v23 }
 0x18b   : > { %1019 = vmatprep.subr.bf16.mxu1 %v1212_v1 }
 0x191   : > { %1016 = vmatmul.mubr.msk.bf16.vlgmr.msra.gmra.mrb[0].mxu1 %vm343_vm2, %v1354_v20 }
 0x192   : > { %1020 = vmatpush3.bf16.msra.mxu1 %v409_v25  ;;  %1021 = vmatprep.mubr.msk.bf16.mxu1 %vm1213_vm1, %v1212_v1 }
 0x193   : > { %1025 = vmatprep.subr.bf16.mxu1 %v1212_v1 }
 0x264   : > { %v384_v26 = vpop.f32.mrb[0].mxu1 }
 0x265   : > { %v1017_v27 = vpop.f32.mrb[1].mxu1  ;;  %v390_v28 = vsel %vm343_vm2, %v384_v26, -inf }
 0x266   : > { %391 = vmax.xlane.f32.xlu0 %v390_v28  ;;  %v387_v29 = vpop.f32.mrb[2].mxu1 }
 0x267   : > { %v1018_v30 = vpop.f32.mrb[3].mxu1 }
 0x27c   : > { %514 = vrot.lane.b32.xlu0 %v1354_v20, %s1216_s10  ;;  %s213_s10 = sand.u32 1, %s1202_s19  }
 0x2f3   : > { %v392_v31 = vpop.xlane.xlu0 %391 }
 0x2f4   : > { %v393_v32 = vsub.f32 %v384_v26, %v392_v31 }
 0x2f6   : > { %v394_v33 = vmul.f32 1.442695, %v393_v32 }
 0x2f7   : > { %v515_v42 = vpop.permute.xlu0 %514 }
 0x2f8   : > { %1132 = vpow2.f32 %v394_v33  ;;  %v520_v44 = vsel %vm407_vm3, %v515_v42, 0 }
 0x302   : > { %v1133_v34 = vpop.eup %1132 }
 0x303   : > { %v396_v35 = vsel %vm343_vm2, %v1133_v34, 0.0 }
 0x304   : > { %397 = vadd.xlane.f32.xlu1 %v396_v35 }
 0x315   : > { %454 = vrot.lane.b32.xlu1 %v1354_v20, %s1217_s11  ;;  %s945_s11 = sshll.u32 %s213_s10, 3 }
 0x319   : > { %452 = vrot.lane.b32.xlu1 %v1354_v20, %s1218_s12 }
 0x391   : > { %v398_v36 = vpop.xlane.xlu1 %397 }
 0x392   : > { %1134 = vrcp.f32 %v398_v36 }
 0x395   : > { %v455_v39 = vpop.permute.xlu1 %454 }
 0x396   : > { %v460_v41 = vsel %vm343_vm2, %v455_v39, 0 }
 0x399   : > { %v453_v43 = vpop.permute.xlu1 %452 }
 0x39c   : > { %v1135_v37 = vpop.eup %1134 }
 0x39d   : > { %v400_v38 = vmul.f32 %v1135_v37, %v1133_v34 }
 0x39f   : > { %v401_v40 = vpack.c.bf16 %v400_v38, %v400_v38 }
 0x3a1   : > { %1022 = vmatmul.mubr.msk.bf16.vlgmr.msra.gmra.mrb[4].mxu1 %vm343_vm2, %v401_v40 }
 0x3a2   : > { %1026 = vmatpush3.bf16.xpose.msra.mxu1 %v460_v41  ;;  %1027 = vmatprep.mubr.msk.bf16.mxu1 %vm1213_vm1, %v1212_v1 }
 0x3a3   : > { %1031 = vmatprep.subr.bf16.mxu1 %v1212_v1 }
 0x3a9   : > { %1028 = vmatmul.mubr.msk.bf16.vlgmr.msra.gmra.mrb[8].mxu1 %vm343_vm2, %v453_v43 }
 0x3aa   : > { %1032 = vmatpush3.bf16.msra.mxu1 %v520_v44  ;;  %1033 = vmatprep.mubr.msk.bf16.mxu1 %vm1213_vm1, %v1212_v1 }
 0x3ab   : > { %1037 = vmatprep.subr.bf16.mxu1 %v1212_v1 }
 0x474   : > { %v445_v45 = vpop.f32.mrb[4].mxu1 }
 0x475   : > { %451 = vst.msk [vmem:[#allocation2] sm:$0xff] %vm343_vm2, %v445_v45  ;;  %v1023_v46 = vpop.f32.mrb[5].mxu1 }
 0x476   : > { %v448_v47 = vpop.f32.mrb[6].mxu1 }
 0x477   : > { %v1024_v48 = vpop.f32.mrb[7].mxu1 }
 0x47c   : > { %v496_v49 = vpop.f32.mrb[8].mxu1 }
 0x47d   : > { %v1029_v50 = vpop.f32.mrb[9].mxu1  ;;  %v502_v51 = vsel %vm343_vm2, %v496_v49, -inf }
 0x47e   : > { %503 = vmax.xlane.f32.xlu1 %v502_v51  ;;  %v499_v52 = vpop.f32.mrb[10].mxu1  ;;  %v1131_v50 = vld [vmem:[%s1478_s3 + $0x8] sm:$0xff]  }
 0x47f   : > { %v1030_v53 = vpop.f32.mrb[11].mxu1  ;;  %v825_v51 = vsel %vm277_vm0, %v1131_v50, 0 }
 0x50b   : > { %v504_v54 = vpop.xlane.xlu1 %503 }
 0x50c   : > { %v505_v55 = vsub.f32 %v496_v49, %v504_v54 }
 0x50e   : > { %v506_v56 = vmul.f32 1.442695, %v505_v55 }
 0x510   : > { %1136 = vpow2.f32 %v506_v56 }
 0x51a   : > { %v1137_v57 = vpop.eup %1136 }
 0x51b   : > { %v508_v58 = vsel %vm343_vm2, %v1137_v57, 0.0 }
 0x51c   : > { %509 = vadd.xlane.f32.xlu0 %v508_v58  ;;  %v963_v58 = vld [vmem:[%s1479_s4] ss:$0 sm:$0xff] }
 0x532   : > { %570 = vrot.lane.b32.xlu0 %v1354_v20, %s1219_s13 }
 0x536   : > { %568 = vrot.lane.b32.xlu0 %v1354_v20, %s1220_s14  ;;  %s968_s14 = sshll.u32 %s1280_s22, 7  ;;  %s869_s22 = scalar_lea.sflag [#allocation4], %s213_s10 }
 0x5a9   : > { %v510_v59 = vpop.xlane.xlu0 %509 }
 0x5aa   : > { %1138 = vrcp.f32 %v510_v59 }
 0x5ad   : > { %v571_v62 = vpop.permute.xlu0 %570 }
 0x5ae   : > { %v576_v0 = vsel %vm343_vm2, %v571_v62, 0 }
 0x5b1   : > { %v569_v2 = vpop.permute.xlu0 %568 }
 0x5b4   : > { %v1139_v60 = vpop.eup %1138 }
 0x5b5   : > { %v512_v61 = vmul.f32 %v1139_v60, %v1137_v57 }
 0x5b7   : > { %v513_v63 = vpack.c.bf16 %v512_v61, %v512_v61 }
 0x5b9   : > { %1034 = vmatmul.mubr.msk.bf16.vlgmr.msra.gmra.mrb[12].mxu1 %vm343_vm2, %v513_v63 }
 0x5ba   : > { %1038 = vmatpush3.bf16.xpose.msra.mxu1 %v576_v0  ;;  %1039 = vmatprep.mubr.msk.bf16.mxu1 %vm1213_vm1, %v1212_v1 }
 0x5bb   : > { %1043 = vmatprep.subr.bf16.mxu1 %v1212_v1 }
 0x5c1   : > { %1040 = vmatmul.mubr.msk.bf16.vlgmr.msra.gmra.mrb[16].mxu1 %vm343_vm2, %v569_v2 }
 0x5c2   : > { %1045 = vmatprep.mubr.msk.bf16.mxu1 %vm1213_vm1, %v1212_v1 }
 0x68c   : > { %v556_v3 = vpop.f32.mrb[12].mxu1 }
 0x68d   : > { %v1035_v4 = vpop.f32.mrb[13].mxu1 }
 0x68e   : > { %v559_v5 = vpop.f32.mrb[14].mxu1 }
 0x68f   : > { %v1036_v6 = vpop.f32.mrb[15].mxu1 }
 0x694   : > { %v612_v7 = vpop.f32.mrb[16].mxu1 }
 0x695   : > { %v1041_v8 = vpop.f32.mrb[17].mxu1  ;;  %v618_v9 = vsel %vm343_vm2, %v612_v7, -inf }
 0x696   : > { %619 = vmax.xlane.f32.xlu1 %v618_v9  ;;  %v615_v10 = vpop.f32.mrb[18].mxu1 }
 0x697   : > { %v1042_v11 = vpop.f32.mrb[19].mxu1 }
 0x6a7   : > { %630 = vrot.lane.b32.xlu1 %v1354_v20, %s1221_s15  ;;  %s215_s15 = scalar_lea.vmem [#allocation3], %s945_s11 }
 0x6ab   : > { %686 = vrot.lane.b32.xlu1 %v1354_v20, %s1222_s16  ;;  %s882_s16 = sshll.u32 %s215_s15, 4  ;;  %s1434_s16 = int_to_ptr.vmem [resolvable:$true] %s882_s16 }
 0x6ac   : > { %p1155_p0 = scmp.lt.s32.totalorder %s1434_s16, %s1153_s6 }
 0x6af   : > { %684 = vrot.lane.b32.xlu1 %v1354_v20, %s1223_s17 }
 0x723   : > { %v620_v12 = vpop.xlane.xlu1 %619 }
 0x724   : > { %v621_v13 = vsub.f32 %v612_v7, %v620_v12 }
 0x726   : > { %v622_v14 = vmul.f32 1.442695, %v621_v13 }
 0x727   : > { %v631_v15 = vpop.permute.xlu1 %630 }
 0x728   : > { %1140 = vpow2.f32 %v622_v14  ;;  %v636_v16 = vsel %vm407_vm3, %v631_v15, 0 }
 0x729   : > { %1044 = vmatpush3.bf16.msra.mxu1 %v636_v16 }
 0x72a   : > { %1049 = vmatprep.subr.bf16.mxu1 %v1212_v1 }
 0x72b   : > { %v687_v23 = vpop.permute.xlu1 %686 }
 0x72c   : > { %v692_v25 = vsel %vm343_vm2, %v687_v23, 0 }
 0x72f   : > { %v685_v26 = vpop.permute.xlu1 %684 }
 0x732   : > { %v1141_v17 = vpop.eup %1140 }
 0x733   : > { %v624_v18 = vsel %vm343_vm2, %v1141_v17, 0.0 }
 0x734   : > { %625 = vadd.xlane.f32.xlu0 %v624_v18 }
 0x7c1   : > { %v626_v19 = vpop.xlane.xlu0 %625 }
 0x7c2   : > { %1142 = vrcp.f32 %v626_v19 }
 0x7cc   : > { %v1143_v21 = vpop.eup %1142 }
 0x7cd   : > { %v628_v22 = vmul.f32 %v1143_v21, %v1141_v17 }
 0x7cf   : > { %v629_v24 = vpack.c.bf16 %v628_v22, %v628_v22 }
 0x7d1   : > { %1046 = vmatmul.mubr.msk.bf16.vlgmr.msra.gmra.mrb[20].mxu1 %vm343_vm2, %v629_v24 }
 0x7d2   : > { %1050 = vmatpush3.bf16.xpose.msra.mxu1 %v692_v25  ;;  %1051 = vmatprep.mubr.msk.bf16.mxu1 %vm1213_vm1, %v1212_v1 }
 0x7d3   : > { %1055 = vmatprep.subr.bf16.mxu1 %v1212_v1 }
 0x7d9   : > { %1052 = vmatmul.mubr.msk.bf16.vlgmr.msra.gmra.mrb[24].mxu1 %vm343_vm2, %v685_v26 }
 0x7da   : > { %1057 = vmatprep.mubr.msk.bf16.mxu1 %vm1213_vm1, %v1212_v1 }
 0x8a4   : > { %v672_v27 = vpop.f32.mrb[20].mxu1 }
 0x8a5   : > { %v1047_v28 = vpop.f32.mrb[21].mxu1 }
 0x8a6   : > { %v675_v29 = vpop.f32.mrb[22].mxu1 }
 0x8a7   : > { %v1048_v30 = vpop.f32.mrb[23].mxu1 }
 0x8ac   : > { %v728_v31 = vpop.f32.mrb[24].mxu1 }
 0x8ad   : > { %v1053_v32 = vpop.f32.mrb[25].mxu1  ;;  %v734_v33 = vsel %vm343_vm2, %v728_v31, -inf }
 0x8ae   : > { %735 = vmax.xlane.f32.xlu1 %v734_v33  ;;  %v731_v34 = vpop.f32.mrb[26].mxu1 }
 0x8af   : > { %v1054_v35 = vpop.f32.mrb[27].mxu1 }
 0x93b   : > { %v736_v36 = vpop.xlane.xlu1 %735 }
 0x93c   : > { %v737_v37 = vsub.f32 %v728_v31, %v736_v36 }
 0x93e   : > { %v738_v38 = vmul.f32 1.442695, %v737_v37 }
 0x940   : > { %1144 = vpow2.f32 %v738_v38 }
 0x94a   : > { %v1145_v39 = vpop.eup %1144 }
 0x94b   : > { %v740_v40 = vsel %vm343_vm2, %v1145_v39, 0.0 }
 0x94c   : > { %741 = vadd.xlane.f32.xlu0 %v740_v40 }
 0x962   : > { %746 = vrot.lane.b32.xlu0 %v1354_v20, %s1224_s23  ;;  %v1130_v20 = vld [vmem:[%s1478_s3] sm:$0xff]  }
 0x963   : > { %v822_v49 = vsel %vm277_vm0, %v1130_v20, 0 }
 0x964   : > { %1062 = vmatpush3.bf16.xpose.msra.mxu0 %v822_v49 }
 0x965   : > { %1063 = vmatprep.subr.bf16.mxu0 %v1212_v1 }
 0x966   : > { %563 = vrot.lane.b32.xlu0 %v556_v3, %s1225_s25  ;;  %s1432_s25 = scalar_lea.hbm %s1480_s5, %s968_s14 }
 0x96a   : > { %679 = vrot.lane.b32.xlu0 %v672_v27, %s1226_s26  ;;  %s1148_s26 = scalar_lea.vmem %s1434_s16, 128 }
 0x96b   : > { %p1149_p11 = scmp.ne.s32.totalorder %s1434_s16, %s1148_s26  ;;  %p1156_p1 = scmp.lt.s32.totalorder %s1154_s7, %s1148_s26 }
 0x96c   : > { %1064 = vmatpush3.bf16.xpose.msra.mxu0 %v825_v51 }
 0x96d   : > { %p1150_p12 = pnand %p1149_p11, %p1297_p5  ;;  %p1157_p2 = por %p1156_p1, %p1155_p0 }
 0x96f   : > { %p1151_p13 = pneg %p1150_p12 }
 0x971   : > { %p1158_p3 = pnand %p1157_p2, %p1151_p13 }
 0x9d9   : > { %v742_v41 = vpop.xlane.xlu0 %741 }
 0x9da   : > { %1146 = vrcp.f32 %v742_v41 }
 0x9dd   : > { %v747_v42 = vpop.permute.xlu0 %746 }
 0x9de   : > { %v752_v43 = vsel %vm407_vm3, %v747_v42, 0 }
 0x9df   : > { %1056 = vmatpush3.bf16.msra.mxu1 %v752_v43 }
 0x9e1   : > { %v564_v44 = vpop.permute.xlu0 %563 }
 0x9e2   : > { %567 = vst.msk [vmem:[#allocation2] sm:$0xff] %vm566_vm4, %v564_v44 }
 0x9e4   : > { %v1147_v45 = vpop.eup %1146 }
 0x9e5   : > { %v744_v46 = vmul.f32 %v1147_v45, %v1145_v39  ;;  %v680_v47 = vpop.permute.xlu0 %679 }
 0x9e6   : > { %683 = vst.msk [vmem:[#allocation2] sm:$0xff] %vm682_vm5, %v680_v47 }
 0x9e7   : > { %v745_v48 = vpack.c.bf16 %v744_v46, %v744_v46 }
 0x9e9   : > { %1058 = vmatmul.mubr.msk.bf16.vlgmr.msra.gmra.mrb[28].mxu1 %vm343_vm2, %v745_v48 }
 0xabc   : > { %v788_v52 = vpop.f32.mrb[28].mxu1 }
 0xabd   : > { %795 = vrot.lane.b32.xlu1 %v788_v52, %s1227_s9  ;;  %v1059_v53 = vpop.f32.mrb[29].mxu1 }
 0xabe   : > { %v791_v54 = vpop.f32.mrb[30].mxu1 }
 0xabf   : > { %v1060_v55 = vpop.f32.mrb[31].mxu1 }
 0xb2f   : > { %v796_v56 = vpop.permute.xlu1 %795 }
 0xb30   : > { %799 = vst.msk [vmem:[#allocation2] sm:$0xff] %vm798_vm6, %v796_v56 }
 0xb37   : > { %v800_v57 = vld [vmem:[#allocation2] sm:$0xff] }
 0xb38   : > { %v801_v1 = vpack.c.bf16 %v800_v57, %v800_v57 }
 0xb3a   : > { %1066 = vmatmul.mubr.msk.bf16.vlgmr.msra.gmra.mrb[4].mxu0 %vm277_vm0, %v801_v1 }
 0xc0d   : > { %v861_v59 = vpop.f32.mrb[4].mxu0 }
 0xc0e   : > { %v862_v60 = vadd.f32 %v963_v58, %v861_v59  ;;  %v1067_v61 = vpop.f32.mrb[5].mxu0 }
 0xc0f   : > { %v864_v62 = vpop.f32.mrb[6].mxu0 }
 0xc10   : > { %v1068_v63 = vpop.f32.mrb[7].mxu0  ;;  %867 = vst.msk [vmem:[%s215_s15] sm:$0xff] %vm277_vm0, %v862_v60 }
 0xc11   : > { %1161 = shalt.err (!%p1158_p3)
}
 0xc12   : > { %s1162_s8 = scalar_lea.hbm %s1432_s25, 128  ;;  %s1166_s11 = scalar_lea.hbm %s1480_s5, 256 }
 0xc13   : > { %p1163_p4 = scmp.ne.s32.totalorder %s1432_s25, %s1162_s8  ;;  %p1167_p9 = scmp.lt.u32.totalorder %s1432_s25, %s1480_s5 }
 0xc14   : > { %p1168_p10 = scmp.lt.u32.totalorder %s1166_s11, %s1162_s8  ;;  %p1170_p12 = scmp.lt.u32.totalorder %s1162_s8, %s1432_s25 }
 0xc15   : > { %p1164_p7 = pnand %p1163_p4, %p1297_p5 }
 0xc16   : > { %p1169_p11 = por %p1168_p10, %p1167_p9 }
 0xc17   : > { %p1165_p8 = pneg %p1164_p7 }
 0xc18   : > { %p1171_p13 = por %p1170_p12, %p1169_p11 }
 0xc1a   : > { %p1172_p0 = pnand %p1171_p13, %p1165_p8 }
 0xc1c   : > { %1175 = shalt.err (!%p1172_p0)
}
 0xc1d   : > { %1069 = dma.vmem_to_hbm [thread:$0]  (%p1297_p5), %s1434_s16, 128, %s1432_s25, %s869_s22  }
 0xc1e PF: > { %p1075_p1 = scmp.ge.s32.totalorder %s1210_s21, 2  ;;  %s894_s14 = sand.u32 1, %s1198_s18  }
 0xc1f   : > { %s895_s15 = scalar_lea.sflag [#allocation4], %s894_s14 }
 0xc20   : > { %p1072_p2 = pnand %p1075_p1, %p1301_p6 }
 0xc22   : > { %1193 = dma.done.wait (!%p1072_p2), %s895_s15, 128  }
 0xc23   : > { %1195 = vsyncadd (!%p1072_p2), %s895_s15, 4294967168  ;;  %p15_p3 = scmp.ge.s32.totalorder %s1284_s24, 4   ;;  %s1483_s18 = smov %s1202_s19 }
 0xc24   : > { %s1484_s19 = smov %s1206_s20  ;;  %s1485_s20 = smov %s1295_s27 }
 0xc25   : > { %s1486_s21 = smov %s1284_s24  ;;  %17 = sbr.rel (!%p15_p3) target bundleno = 3 (0x3), region = 75 }
 0xc2c   :  { %900 = vsyncpa [#allocation4], 1 }
 0xc2d   :  { %902 = vsyncpa [#allocation4 + $0x1], 1 }

</bundles_post_ra>
